<compile_context>
chip_gen: v7x
topology: tpu7x:2x2x1
jax: 0.10.0
libtpu: 0.0.40
codegen_flags: <defaults>
</compile_context>

<pallas_src>
import numpy as np
import jax
import jax.numpy as jnp
from jax import lax
from jax.experimental import pallas as pl
from jax.experimental.pallas import tpu as pltpu


def mscfb_pallas(x, p):
    """x: (N, C, H, W) float32 in PyTorch NCHW layout. Returns (N, C, H, W)."""
    N, C, H, W = x.shape
    G = C // 4
    HW = H * W
    hid = p["cca_w1"].shape[0]

    # ---- fold channel_shuffle(groups=4) into the CCA / tail weights --------
    old = np.arange(C)
    new_of_old = (old % G) * 4 + old // G          # shuffled index of channel `old`
    cca_w1 = jnp.asarray(np.asarray(p["cca_w1"])[:, new_of_old], jnp.float32)
    cca_b1 = jnp.asarray(np.asarray(p["cca_b1"]).reshape(hid, 1), jnp.float32)
    cca_w2 = jnp.asarray(np.asarray(p["cca_w2"])[new_of_old, :], jnp.float32)
    cca_b2 = jnp.asarray(np.asarray(p["cca_b2"])[new_of_old].reshape(C, 1), jnp.float32)
    tail_w = jnp.asarray(np.asarray(p["tail_w"])[:, new_of_old], jnp.bfloat16)
    tail_b = jnp.asarray(np.asarray(p["tail_b"]).reshape(C, 1), jnp.float32)
    head_w = jnp.asarray(np.asarray(p["head_w"]), jnp.bfloat16)
    head_b = jnp.asarray(np.asarray(p["head_b"]).reshape(C, 1), jnp.float32)

    # ---- block-diagonal per-tap weights for the fused conv stages ----------
    w3 = np.asarray(p["w3"], np.float32)           # (6, G, G, 3, 3)  OIHW per conv
    b3 = np.asarray(p["b3"], np.float32)           # (6, G)

    def stage_weights(kids):
        n = len(kids)
        CS = n * G
        w = np.zeros((9, CS, CS), np.float32)
        for t in range(9):
            kh, kw = divmod(t, 3)
            for b, kid in enumerate(kids):
                w[t, b * G:(b + 1) * G, b * G:(b + 1) * G] = w3[kid, :, :, kh, kw]
        bias = np.concatenate([b3[kid] for kid in kids]).reshape(CS, 1)
        return jnp.asarray(w, jnp.bfloat16), jnp.asarray(bias, jnp.float32)

    ws1, bs1 = stage_weights([0, 1, 3])            # -> [y2 ; t3 ; t4]
    ws2, bs2 = stage_weights([2, 4])               # -> [y3 ; t4]
    ws3, bs3 = stage_weights([5])                  # -> [y4]

    # ---- per-tap validity masks over the flattened pixel axis --------------
    hh, ww = np.meshgrid(np.arange(H), np.arange(W), indexing="ij")
    masks_np = np.zeros((9, 1, HW), np.float32)
    for t in range(9):
        dh, dw = t // 3 - 1, t % 3 - 1
        ok = (hh + dh >= 0) & (hh + dh < H) & (ww + dw >= 0) & (ww + dw < W)
        masks_np[t, 0] = ok.reshape(HW).astype(np.float32)
    masks = jnp.asarray(masks_np)

    x_flat = x.reshape(N, C, HW)

    def kernel(x_ref, m_ref, hw_ref, hb_ref,
               ws1_ref, bs1_ref, ws2_ref, bs2_ref, ws3_ref, bs3_ref,
               cw1_ref, cb1_ref, cw2_ref, cb2_ref, tw_ref, tb_ref, o_ref):
        xcp = x_ref[0]                               # (C, HW) f32
        msk = m_ref[...]                             # (9, 1, HW) f32

        def lrelu(v):
            return jnp.maximum(v, 0.05 * v)          # LeakyReLU(negative_slope=0.05)

        def conv_stage(v, w_ref, b_ref):
            # v: (CS, HW) f32; w_ref: (9, CS, CS) bf16 block-diagonal tap weights.
            CS = v.shape[0]
            acc = jnp.zeros((CS, HW), jnp.float32)
            for t in range(9):
                dh, dw = t // 3 - 1, t % 3 - 1
                d = dh * W + dw                      # flat-pixel offset of this tap
                if d == 0:
                    nb = v
                else:
                    # neighbor gather: XLU lane roll + boundary mask (zero padding)
                    nb = pltpu.roll(v, (-d) % HW, axis=1) * msk[t]
                acc = acc + jnp.dot(w_ref[t], nb.astype(jnp.bfloat16),
                                    preferred_element_type=jnp.float32)
            return acc + b_ref[...]

        # confusion_head (1x1 conv as (C,C)@(C,HW) matmul)
        low = jnp.dot(hw_ref[...], xcp.astype(jnp.bfloat16),
                      preferred_element_type=jnp.float32) + hb_ref[...]

        # fused multi-scale 3x3 conv stages
        s1 = lrelu(conv_stage(low[G:, :], ws1_ref, bs1_ref))   # (3G, HW) = [y2; t3; t4]
        s2 = lrelu(conv_stage(s1[G:, :], ws2_ref, bs2_ref))    # (2G, HW) = [y3; t4]
        y4 = lrelu(conv_stage(s2[G:, :], ws3_ref, bs3_ref))    # ( G, HW)

        cat = jnp.concatenate([low[:G, :], s1[:G, :], s2[:G, :], y4], axis=0)  # (C, HW)

        # CCA layer (channel shuffle already folded into cw1/cw2/cb2/tw)
        pooled = jnp.mean(cat, axis=1, keepdims=True)                    # (C, 1)
        z = jnp.maximum(
            jnp.dot(cw1_ref[...], pooled, preferred_element_type=jnp.float32)
            + cb1_ref[...], 0.0)                                         # (hid, 1)
        sgate = jax.nn.sigmoid(
            jnp.dot(cw2_ref[...], z, preferred_element_type=jnp.float32)
            + cb2_ref[...])                                              # (C, 1)
        scaled = cat * sgate

        # confusion_tail (1x1 conv) + residual
        tail = jnp.dot(tw_ref[...], scaled.astype(jnp.bfloat16),
                       preferred_element_type=jnp.float32) + tb_ref[...]
        o_ref[0] = (tail + xcp).astype(o_ref.dtype)

    consts = [masks, head_w, head_b, ws1, bs1, ws2, bs2, ws3, bs3,
              cca_w1, cca_b1, cca_w2, cca_b2, tail_w, tail_b]

    def _const_spec(a):
        nd = a.ndim
        return pl.BlockSpec(a.shape, lambda n, _nd=nd: (0,) * _nd)

    out_flat = pl.pallas_call(
        kernel,
        out_shape=jax.ShapeDtypeStruct((N, C, HW), jnp.float32),
        grid=(N,),
        in_specs=[pl.BlockSpec((1, C, HW), lambda n: (n, 0, 0))]
                 + [_const_spec(a) for a in consts],
        out_specs=pl.BlockSpec((1, C, HW), lambda n: (n, 0, 0)),
        compiler_params=pltpu.CompilerParams(
            dimension_semantics=("parallel",)),   # megacore split on v7x
    )(x_flat, *consts)
    return out_flat.reshape(N, C, H, W)


def mscfb_ref(x, p):
    """Pure-JAX NCHW reference mirroring the PyTorch forward (f32)."""
    N, C, H, W = x.shape
    G = C // 4
    lrelu = lambda v: jnp.where(v >= 0, v, 0.05 * v)

    def conv1(v, w, b):
        return jnp.einsum("oi,nihw->nohw", w, v) + b[None, :, None, None]

    def conv3(v, w, b):
        return lax.conv_general_dilated(
            v, w, (1, 1), "SAME",
            dimension_numbers=("NCHW", "OIHW", "NCHW")) + b[None, :, None, None]

    w3, b3 = p["w3"], p["b3"]
    low = conv1(x, p["head_w"], p["head_b"])
    xs = [low[:, i * G:(i + 1) * G] for i in range(4)]
    y1 = xs[0]
    y2 = lrelu(conv3(xs[1], w3[0], b3[0]))
    t = lrelu(conv3(xs[2], w3[1], b3[1]))
    y3 = lrelu(conv3(t, w3[2], b3[2]))
    t = lrelu(conv3(xs[3], w3[3], b3[3]))
    t = lrelu(conv3(t, w3[4], b3[4]))
    y4 = lrelu(conv3(t, w3[5], b3[5]))
    cat = jnp.concatenate([y1, y2, y3, y4], axis=1)
    shuf = cat.reshape(N, 4, G, H, W).swapaxes(1, 2).reshape(N, C, H, W)
    pooled = jnp.mean(shuf, axis=(2, 3), keepdims=True)
    z = jnp.maximum(conv1(pooled, p["cca_w1"], p["cca_b1"]), 0.0)
    s = jax.nn.sigmoid(conv1(z, p["cca_w2"], p["cca_b2"]))
    tail = conv1(shuf * s, p["tail_w"], p["tail_b"])
    return tail + x


if __name__ == "__main__":
    G0, K = 32, 3                     # n_feats (split(.., 8) -> 4 groups), kernel_size
    N, H, W = 2, 16, 16
    G = G0 // 4
    hid = G0 // 16                    # CCA reduction = 16 -> hidden = 2

    key = jax.random.PRNGKey(0)
    ks = jax.random.split(key, 11)
    sc = 0.1
    params = {
        "head_w": sc * jax.random.normal(ks[0], (G0, G0), jnp.float32),
        "head_b": sc * jax.random.normal(ks[1], (G0,), jnp.float32),
        "w3":     sc * jax.random.normal(ks[2], (6, G, G, K, K), jnp.float32),
        "b3":     sc * jax.random.normal(ks[3], (6, G), jnp.float32),
        "cca_w1": sc * jax.random.normal(ks[4], (hid, G0), jnp.float32),
        "cca_b1": sc * jax.random.normal(ks[5], (hid,), jnp.float32),
        "cca_w2": sc * jax.random.normal(ks[6], (G0, hid), jnp.float32),
        "cca_b2": sc * jax.random.normal(ks[7], (G0,), jnp.float32),
        "tail_w": sc * jax.random.normal(ks[8], (G0, G0), jnp.float32),
        "tail_b": sc * jax.random.normal(ks[9], (G0,), jnp.float32),
    }

    # NCHW input exactly as the PyTorch module would see it -- no transposes.
    x = jax.random.normal(ks[10], (N, G0, H, W), jnp.float32)

    out = jax.block_until_ready(mscfb_pallas(x, params))
    ref = mscfb_ref(x, params)
    err = float(jnp.max(jnp.abs(out - ref)))

    assert out.shape == (N, G0, H, W)
    assert np.isfinite(np.asarray(out)).all()
    assert err < 5e-2, f"max abs err vs reference: {err}"
    print("KERNEL_OK")
</pallas_src>

<mosaic_0001>
module attributes {stable_mosaic.version = 11 : i64} {
  func.func @kernel(%arg0: i32, %arg1: memref<1x32x256xf32, #tpu.memory_space<vmem>>, %arg2: memref<9x1x256xf32, #tpu.memory_space<vmem>>, %arg3: memref<32x32xbf16, #tpu.memory_space<vmem>>, %arg4: memref<32x1xf32, #tpu.memory_space<vmem>>, %arg5: memref<9x24x24xbf16, #tpu.memory_space<vmem>>, %arg6: memref<24x1xf32, #tpu.memory_space<vmem>>, %arg7: memref<9x16x16xbf16, #tpu.memory_space<vmem>>, %arg8: memref<16x1xf32, #tpu.memory_space<vmem>>, %arg9: memref<9x8x8xbf16, #tpu.memory_space<vmem>>, %arg10: memref<8x1xf32, #tpu.memory_space<vmem>>, %arg11: memref<2x32xf32, #tpu.memory_space<vmem>>, %arg12: memref<2x1xf32, #tpu.memory_space<vmem>>, %arg13: memref<32x2xf32, #tpu.memory_space<vmem>>, %arg14: memref<32x1xf32, #tpu.memory_space<vmem>>, %arg15: memref<32x32xbf16, #tpu.memory_space<vmem>>, %arg16: memref<32x1xf32, #tpu.memory_space<vmem>>, %arg17: memref<1x32x256xf32, #tpu.memory_space<vmem>>) attributes {dimension_semantics = [#tpu.dimension_semantics<parallel>], iteration_bounds = array<i64: 2>, scalar_prefetch = 0 : i64, scratch_operands = 0 : i64, tpu.core_type = #tpu.core_type<tc>, window_params = [{transform_indices = @transform_0, window_bounds = array<i64: 1, 32, 256>}, {pipeline_mode = #tpu.pipeline_mode<synchronous>, transform_indices = @transform_1, window_bounds = array<i64: 9, 1, 256>}, {pipeline_mode = #tpu.pipeline_mode<synchronous>, transform_indices = @transform_2, window_bounds = array<i64: 32, 32>}, {pipeline_mode = #tpu.pipeline_mode<synchronous>, transform_indices = @transform_3, window_bounds = array<i64: 32, 1>}, {pipeline_mode = #tpu.pipeline_mode<synchronous>, transform_indices = @transform_4, window_bounds = array<i64: 9, 24, 24>}, {pipeline_mode = #tpu.pipeline_mode<synchronous>, transform_indices = @transform_5, window_bounds = array<i64: 24, 1>}, {pipeline_mode = #tpu.pipeline_mode<synchronous>, transform_indices = @transform_6, window_bounds = array<i64: 9, 16, 16>}, {pipeline_mode = #tpu.pipeline_mode<synchronous>, transform_indices = @transform_7, window_bounds = array<i64: 16, 1>}, {pipeline_mode = #tpu.pipeline_mode<synchronous>, transform_indices = @transform_8, window_bounds = array<i64: 9, 8, 8>}, {pipeline_mode = #tpu.pipeline_mode<synchronous>, transform_indices = @transform_9, window_bounds = array<i64: 8, 1>}, {pipeline_mode = #tpu.pipeline_mode<synchronous>, transform_indices = @transform_10, window_bounds = array<i64: 2, 32>}, {pipeline_mode = #tpu.pipeline_mode<synchronous>, transform_indices = @transform_11, window_bounds = array<i64: 2, 1>}, {pipeline_mode = #tpu.pipeline_mode<synchronous>, transform_indices = @transform_12, window_bounds = array<i64: 32, 2>}, {pipeline_mode = #tpu.pipeline_mode<synchronous>, transform_indices = @transform_13, window_bounds = array<i64: 32, 1>}, {pipeline_mode = #tpu.pipeline_mode<synchronous>, transform_indices = @transform_14, window_bounds = array<i64: 32, 32>}, {pipeline_mode = #tpu.pipeline_mode<synchronous>, transform_indices = @transform_15, window_bounds = array<i64: 32, 1>}, {transform_indices = @transform_16, window_bounds = array<i64: 1, 32, 256>}]} {
    %c0 = arith.constant 0 : index
    %c0_0 = arith.constant 0 : index
    %c0_1 = arith.constant 0 : index
    %0 = vector.load %arg1[%c0, %c0_0, %c0_1] : memref<1x32x256xf32, #tpu.memory_space<vmem>>, vector<1x32x256xf32>
    %1 = vector.shape_cast %0 : vector<1x32x256xf32> to vector<32x256xf32>
    %c0_2 = arith.constant 0 : index
    %c0_3 = arith.constant 0 : index
    %c0_4 = arith.constant 0 : index
    %2 = vector.load %arg2[%c0_2, %c0_3, %c0_4] : memref<9x1x256xf32, #tpu.memory_space<vmem>>, vector<9x1x256xf32>
    %c0_5 = arith.constant 0 : index
    %c0_6 = arith.constant 0 : index
    %3 = vector.load %arg3[%c0_5, %c0_6] : memref<32x32xbf16, #tpu.memory_space<vmem>>, vector<32x32xbf16>
    %4 = arith.truncf %1 : vector<32x256xf32> to vector<32x256xbf16>
    %cst = arith.constant dense<0.000000e+00> : vector<32x256xf32>
    %5 = tpu.matmul %3, %4, %cst {dimension_numbers = #tpu.dot_dimension_numbers<[1], [0], [0], [1], [0, 0, 1, 1], [], []>} : vector<32x32xbf16>, vector<32x256xbf16>, vector<32x256xf32> -> vector<32x256xf32>
    %c0_7 = arith.constant 0 : index
    %c0_8 = arith.constant 0 : index
    %6 = vector.load %arg4[%c0_7, %c0_8] : memref<32x1xf32, #tpu.memory_space<vmem>>, vector<32x1xf32>
    %7 = vector.broadcast %6 : vector<32x1xf32> to vector<32x256xf32>
    %8 = arith.addf %5, %7 : vector<32x256xf32>
    %9 = vector.extract_strided_slice %8 {offsets = [8, 0], sizes = [24, 256], strides = [1, 1]} : vector<32x256xf32> to vector<24x256xf32>
    %cst_9 = arith.constant 0.000000e+00 : f32
    %10 = vector.broadcast %cst_9 : f32 to vector<24x256xf32>
    %c17_i32 = arith.constant 17 : i32
    %11 = tpu.dynamic_rotate %9 by %c17_i32 dim 1 : vector<24x256xf32>, i32 -> vector<24x256xf32>
    %12 = vector.extract_strided_slice %2 {offsets = [0, 0, 0], sizes = [1, 1, 256], strides = [1, 1, 1]} : vector<9x1x256xf32> to vector<1x1x256xf32>
    %13 = vector.shape_cast %12 : vector<1x1x256xf32> to vector<1x256xf32>
    %14 = vector.broadcast %13 : vector<1x256xf32> to vector<24x256xf32>
    %15 = arith.mulf %11, %14 : vector<24x256xf32>
    %c0_10 = arith.constant 0 : index
    %c0_11 = arith.constant 0 : index
    %c0_12 = arith.constant 0 : index
    %16 = vector.load %arg5[%c0_10, %c0_11, %c0_12] : memref<9x24x24xbf16, #tpu.memory_space<vmem>>, vector<1x24x24xbf16>
    %17 = vector.shape_cast %16 : vector<1x24x24xbf16> to vector<24x24xbf16>
    %18 = arith.truncf %15 : vector<24x256xf32> to vector<24x256xbf16>
    %cst_13 = arith.constant dense<0.000000e+00> : vector<24x256xf32>
    %19 = tpu.matmul %17, %18, %cst_13 {dimension_numbers = #tpu.dot_dimension_numbers<[1], [0], [0], [1], [0, 0, 1, 1], [], []>} : vector<24x24xbf16>, vector<24x256xbf16>, vector<24x256xf32> -> vector<24x256xf32>
    %20 = arith.addf %10, %19 : vector<24x256xf32>
    %c16_i32 = arith.constant 16 : i32
    %21 = tpu.dynamic_rotate %9 by %c16_i32 dim 1 : vector<24x256xf32>, i32 -> vector<24x256xf32>
    %22 = vector.extract_strided_slice %2 {offsets = [1, 0, 0], sizes = [1, 1, 256], strides = [1, 1, 1]} : vector<9x1x256xf32> to vector<1x1x256xf32>
    %23 = vector.shape_cast %22 : vector<1x1x256xf32> to vector<1x256xf32>
    %24 = vector.broadcast %23 : vector<1x256xf32> to vector<24x256xf32>
    %25 = arith.mulf %21, %24 : vector<24x256xf32>
    %c1 = arith.constant 1 : index
    %c0_14 = arith.constant 0 : index
    %c0_15 = arith.constant 0 : index
    %26 = vector.load %arg5[%c1, %c0_14, %c0_15] : memref<9x24x24xbf16, #tpu.memory_space<vmem>>, vector<1x24x24xbf16>
    %27 = vector.shape_cast %26 : vector<1x24x24xbf16> to vector<24x24xbf16>
    %28 = arith.truncf %25 : vector<24x256xf32> to vector<24x256xbf16>
    %cst_16 = arith.constant dense<0.000000e+00> : vector<24x256xf32>
    %29 = tpu.matmul %27, %28, %cst_16 {dimension_numbers = #tpu.dot_dimension_numbers<[1], [0], [0], [1], [0, 0, 1, 1], [], []>} : vector<24x24xbf16>, vector<24x256xbf16>, vector<24x256xf32> -> vector<24x256xf32>
    %30 = arith.addf %20, %29 : vector<24x256xf32>
    %c15_i32 = arith.constant 15 : i32
    %31 = tpu.dynamic_rotate %9 by %c15_i32 dim 1 : vector<24x256xf32>, i32 -> vector<24x256xf32>
    %32 = vector.extract_strided_slice %2 {offsets = [2, 0, 0], sizes = [1, 1, 256], strides = [1, 1, 1]} : vector<9x1x256xf32> to vector<1x1x256xf32>
    %33 = vector.shape_cast %32 : vector<1x1x256xf32> to vector<1x256xf32>
    %34 = vector.broadcast %33 : vector<1x256xf32> to vector<24x256xf32>
    %35 = arith.mulf %31, %34 : vector<24x256xf32>
    %c2 = arith.constant 2 : index
    %c0_17 = arith.constant 0 : index
    %c0_18 = arith.constant 0 : index
    %36 = vector.load %arg5[%c2, %c0_17, %c0_18] : memref<9x24x24xbf16, #tpu.memory_space<vmem>>, vector<1x24x24xbf16>
    %37 = vector.shape_cast %36 : vector<1x24x24xbf16> to vector<24x24xbf16>
    %38 = arith.truncf %35 : vector<24x256xf32> to vector<24x256xbf16>
    %cst_19 = arith.constant dense<0.000000e+00> : vector<24x256xf32>
    %39 = tpu.matmul %37, %38, %cst_19 {dimension_numbers = #tpu.dot_dimension_numbers<[1], [0], [0], [1], [0, 0, 1, 1], [], []>} : vector<24x24xbf16>, vector<24x256xbf16>, vector<24x256xf32> -> vector<24x256xf32>
    %40 = arith.addf %30, %39 : vector<24x256xf32>
    %c1_i32 = arith.constant 1 : i32
    %41 = tpu.dynamic_rotate %9 by %c1_i32 dim 1 : vector<24x256xf32>, i32 -> vector<24x256xf32>
    %42 = vector.extract_strided_slice %2 {offsets = [3, 0, 0], sizes = [1, 1, 256], strides = [1, 1, 1]} : vector<9x1x256xf32> to vector<1x1x256xf32>
    %43 = vector.shape_cast %42 : vector<1x1x256xf32> to vector<1x256xf32>
    %44 = vector.broadcast %43 : vector<1x256xf32> to vector<24x256xf32>
    %45 = arith.mulf %41, %44 : vector<24x256xf32>
    %c3 = arith.constant 3 : index
    %c0_20 = arith.constant 0 : index
    %c0_21 = arith.constant 0 : index
    %46 = vector.load %arg5[%c3, %c0_20, %c0_21] : memref<9x24x24xbf16, #tpu.memory_space<vmem>>, vector<1x24x24xbf16>
    %47 = vector.shape_cast %46 : vector<1x24x24xbf16> to vector<24x24xbf16>
    %48 = arith.truncf %45 : vector<24x256xf32> to vector<24x256xbf16>
    %cst_22 = arith.constant dense<0.000000e+00> : vector<24x256xf32>
    %49 = tpu.matmul %47, %48, %cst_22 {dimension_numbers = #tpu.dot_dimension_numbers<[1], [0], [0], [1], [0, 0, 1, 1], [], []>} : vector<24x24xbf16>, vector<24x256xbf16>, vector<24x256xf32> -> vector<24x256xf32>
    %50 = arith.addf %40, %49 : vector<24x256xf32>
    %c4 = arith.constant 4 : index
    %c0_23 = arith.constant 0 : index
    %c0_24 = arith.constant 0 : index
    %51 = vector.load %arg5[%c4, %c0_23, %c0_24] : memref<9x24x24xbf16, #tpu.memory_space<vmem>>, vector<1x24x24xbf16>
    %52 = vector.shape_cast %51 : vector<1x24x24xbf16> to vector<24x24xbf16>
    %53 = arith.truncf %9 : vector<24x256xf32> to vector<24x256xbf16>
    %cst_25 = arith.constant dense<0.000000e+00> : vector<24x256xf32>
    %54 = tpu.matmul %52, %53, %cst_25 {dimension_numbers = #tpu.dot_dimension_numbers<[1], [0], [0], [1], [0, 0, 1, 1], [], []>} : vector<24x24xbf16>, vector<24x256xbf16>, vector<24x256xf32> -> vector<24x256xf32>
    %55 = arith.addf %50, %54 : vector<24x256xf32>
    %c255_i32 = arith.constant 255 : i32
    %56 = tpu.dynamic_rotate %9 by %c255_i32 dim 1 : vector<24x256xf32>, i32 -> vector<24x256xf32>
    %57 = vector.extract_strided_slice %2 {offsets = [5, 0, 0], sizes = [1, 1, 256], strides = [1, 1, 1]} : vector<9x1x256xf32> to vector<1x1x256xf32>
    %58 = vector.shape_cast %57 : vector<1x1x256xf32> to vector<1x256xf32>
    %59 = vector.broadcast %58 : vector<1x256xf32> to vector<24x256xf32>
    %60 = arith.mulf %56, %59 : vector<24x256xf32>
    %c5 = arith.constant 5 : index
    %c0_26 = arith.constant 0 : index
    %c0_27 = arith.constant 0 : index
    %61 = vector.load %arg5[%c5, %c0_26, %c0_27] : memref<9x24x24xbf16, #tpu.memory_space<vmem>>, vector<1x24x24xbf16>
    %62 = vector.shape_cast %61 : vector<1x24x24xbf16> to vector<24x24xbf16>
    %63 = arith.truncf %60 : vector<24x256xf32> to vector<24x256xbf16>
    %cst_28 = arith.constant dense<0.000000e+00> : vector<24x256xf32>
    %64 = tpu.matmul %62, %63, %cst_28 {dimension_numbers = #tpu.dot_dimension_numbers<[1], [0], [0], [1], [0, 0, 1, 1], [], []>} : vector<24x24xbf16>, vector<24x256xbf16>, vector<24x256xf32> -> vector<24x256xf32>
    %65 = arith.addf %55, %64 : vector<24x256xf32>
    %c241_i32 = arith.constant 241 : i32
    %66 = tpu.dynamic_rotate %9 by %c241_i32 dim 1 : vector<24x256xf32>, i32 -> vector<24x256xf32>
    %67 = vector.extract_strided_slice %2 {offsets = [6, 0, 0], sizes = [1, 1, 256], strides = [1, 1, 1]} : vector<9x1x256xf32> to vector<1x1x256xf32>
    %68 = vector.shape_cast %67 : vector<1x1x256xf32> to vector<1x256xf32>
    %69 = vector.broadcast %68 : vector<1x256xf32> to vector<24x256xf32>
    %70 = arith.mulf %66, %69 : vector<24x256xf32>
    %c6 = arith.constant 6 : index
    %c0_29 = arith.constant 0 : index
    %c0_30 = arith.constant 0 : index
    %71 = vector.load %arg5[%c6, %c0_29, %c0_30] : memref<9x24x24xbf16, #tpu.memory_space<vmem>>, vector<1x24x24xbf16>
    %72 = vector.shape_cast %71 : vector<1x24x24xbf16> to vector<24x24xbf16>
    %73 = arith.truncf %70 : vector<24x256xf32> to vector<24x256xbf16>
    %cst_31 = arith.constant dense<0.000000e+00> : vector<24x256xf32>
    %74 = tpu.matmul %72, %73, %cst_31 {dimension_numbers = #tpu.dot_dimension_numbers<[1], [0], [0], [1], [0, 0, 1, 1], [], []>} : vector<24x24xbf16>, vector<24x256xbf16>, vector<24x256xf32> -> vector<24x256xf32>
    %75 = arith.addf %65, %74 : vector<24x256xf32>
    %c240_i32 = arith.constant 240 : i32
    %76 = tpu.dynamic_rotate %9 by %c240_i32 dim 1 : vector<24x256xf32>, i32 -> vector<24x256xf32>
    %77 = vector.extract_strided_slice %2 {offsets = [7, 0, 0], sizes = [1, 1, 256], strides = [1, 1, 1]} : vector<9x1x256xf32> to vector<1x1x256xf32>
    %78 = vector.shape_cast %77 : vector<1x1x256xf32> to vector<1x256xf32>
    %79 = vector.broadcast %78 : vector<1x256xf32> to vector<24x256xf32>
    %80 = arith.mulf %76, %79 : vector<24x256xf32>
    %c7 = arith.constant 7 : index
    %c0_32 = arith.constant 0 : index
    %c0_33 = arith.constant 0 : index
    %81 = vector.load %arg5[%c7, %c0_32, %c0_33] : memref<9x24x24xbf16, #tpu.memory_space<vmem>>, vector<1x24x24xbf16>
    %82 = vector.shape_cast %81 : vector<1x24x24xbf16> to vector<24x24xbf16>
    %83 = arith.truncf %80 : vector<24x256xf32> to vector<24x256xbf16>
    %cst_34 = arith.constant dense<0.000000e+00> : vector<24x256xf32>
    %84 = tpu.matmul %82, %83, %cst_34 {dimension_numbers = #tpu.dot_dimension_numbers<[1], [0], [0], [1], [0, 0, 1, 1], [], []>} : vector<24x24xbf16>, vector<24x256xbf16>, vector<24x256xf32> -> vector<24x256xf32>
    %85 = arith.addf %75, %84 : vector<24x256xf32>
    %c239_i32 = arith.constant 239 : i32
    %86 = tpu.dynamic_rotate %9 by %c239_i32 dim 1 : vector<24x256xf32>, i32 -> vector<24x256xf32>
    %87 = vector.extract_strided_slice %2 {offsets = [8, 0, 0], sizes = [1, 1, 256], strides = [1, 1, 1]} : vector<9x1x256xf32> to vector<1x1x256xf32>
    %88 = vector.shape_cast %87 : vector<1x1x256xf32> to vector<1x256xf32>
    %89 = vector.broadcast %88 : vector<1x256xf32> to vector<24x256xf32>
    %90 = arith.mulf %86, %89 : vector<24x256xf32>
    %c8 = arith.constant 8 : index
    %c0_35 = arith.constant 0 : index
    %c0_36 = arith.constant 0 : index
    %91 = vector.load %arg5[%c8, %c0_35, %c0_36] : memref<9x24x24xbf16, #tpu.memory_space<vmem>>, vector<1x24x24xbf16>
    %92 = vector.shape_cast %91 : vector<1x24x24xbf16> to vector<24x24xbf16>
    %93 = arith.truncf %90 : vector<24x256xf32> to vector<24x256xbf16>
    %cst_37 = arith.constant dense<0.000000e+00> : vector<24x256xf32>
    %94 = tpu.matmul %92, %93, %cst_37 {dimension_numbers = #tpu.dot_dimension_numbers<[1], [0], [0], [1], [0, 0, 1, 1], [], []>} : vector<24x24xbf16>, vector<24x256xbf16>, vector<24x256xf32> -> vector<24x256xf32>
    %95 = arith.addf %85, %94 : vector<24x256xf32>
    %c0_38 = arith.constant 0 : index
    %c0_39 = arith.constant 0 : index
    %96 = vector.load %arg6[%c0_38, %c0_39] : memref<24x1xf32, #tpu.memory_space<vmem>>, vector<24x1xf32>
    %97 = vector.broadcast %96 : vector<24x1xf32> to vector<24x256xf32>
    %98 = arith.addf %95, %97 : vector<24x256xf32>
    %cst_40 = arith.constant 5.000000e-02 : f32
    %99 = vector.broadcast %cst_40 : f32 to vector<24x256xf32>
    %100 = arith.mulf %99, %98 : vector<24x256xf32>
    %101 = arith.maximumf %98, %100 : vector<24x256xf32>
    %102 = vector.extract_strided_slice %101 {offsets = [8, 0], sizes = [16, 256], strides = [1, 1]} : vector<24x256xf32> to vector<16x256xf32>
    %cst_41 = arith.constant 0.000000e+00 : f32
    %103 = vector.broadcast %cst_41 : f32 to vector<16x256xf32>
    %c17_i32_42 = arith.constant 17 : i32
    %104 = tpu.dynamic_rotate %102 by %c17_i32_42 dim 1 : vector<16x256xf32>, i32 -> vector<16x256xf32>
    %105 = vector.extract_strided_slice %2 {offsets = [0, 0, 0], sizes = [1, 1, 256], strides = [1, 1, 1]} : vector<9x1x256xf32> to vector<1x1x256xf32>
    %106 = vector.shape_cast %105 : vector<1x1x256xf32> to vector<1x256xf32>
    %107 = vector.broadcast %106 : vector<1x256xf32> to vector<16x256xf32>
    %108 = arith.mulf %104, %107 : vector<16x256xf32>
    %c0_43 = arith.constant 0 : index
    %c0_44 = arith.constant 0 : index
    %c0_45 = arith.constant 0 : index
    %109 = vector.load %arg7[%c0_43, %c0_44, %c0_45] : memref<9x16x16xbf16, #tpu.memory_space<vmem>>, vector<1x16x16xbf16>
    %110 = vector.shape_cast %109 : vector<1x16x16xbf16> to vector<16x16xbf16>
    %111 = arith.truncf %108 : vector<16x256xf32> to vector<16x256xbf16>
    %cst_46 = arith.constant dense<0.000000e+00> : vector<16x256xf32>
    %112 = tpu.matmul %110, %111, %cst_46 {dimension_numbers = #tpu.dot_dimension_numbers<[1], [0], [0], [1], [0, 0, 1, 1], [], []>} : vector<16x16xbf16>, vector<16x256xbf16>, vector<16x256xf32> -> vector<16x256xf32>
    %113 = arith.addf %103, %112 : vector<16x256xf32>
    %c16_i32_47 = arith.constant 16 : i32
    %114 = tpu.dynamic_rotate %102 by %c16_i32_47 dim 1 : vector<16x256xf32>, i32 -> vector<16x256xf32>
    %115 = vector.extract_strided_slice %2 {offsets = [1, 0, 0], sizes = [1, 1, 256], strides = [1, 1, 1]} : vector<9x1x256xf32> to vector<1x1x256xf32>
    %116 = vector.shape_cast %115 : vector<1x1x256xf32> to vector<1x256xf32>
    %117 = vector.broadcast %116 : vector<1x256xf32> to vector<16x256xf32>
    %118 = arith.mulf %114, %117 : vector<16x256xf32>
    %c1_48 = arith.constant 1 : index
    %c0_49 = arith.constant 0 : index
    %c0_50 = arith.constant 0 : index
    %119 = vector.load %arg7[%c1_48, %c0_49, %c0_50] : memref<9x16x16xbf16, #tpu.memory_space<vmem>>, vector<1x16x16xbf16>
    %120 = vector.shape_cast %119 : vector<1x16x16xbf16> to vector<16x16xbf16>
    %121 = arith.truncf %118 : vector<16x256xf32> to vector<16x256xbf16>
    %cst_51 = arith.constant dense<0.000000e+00> : vector<16x256xf32>
    %122 = tpu.matmul %120, %121, %cst_51 {dimension_numbers = #tpu.dot_dimension_numbers<[1], [0], [0], [1], [0, 0, 1, 1], [], []>} : vector<16x16xbf16>, vector<16x256xbf16>, vector<16x256xf32> -> vector<16x256xf32>
    %123 = arith.addf %113, %122 : vector<16x256xf32>
    %c15_i32_52 = arith.constant 15 : i32
    %124 = tpu.dynamic_rotate %102 by %c15_i32_52 dim 1 : vector<16x256xf32>, i32 -> vector<16x256xf32>
    %125 = vector.extract_strided_slice %2 {offsets = [2, 0, 0], sizes = [1, 1, 256], strides = [1, 1, 1]} : vector<9x1x256xf32> to vector<1x1x256xf32>
    %126 = vector.shape_cast %125 : vector<1x1x256xf32> to vector<1x256xf32>
    %127 = vector.broadcast %126 : vector<1x256xf32> to vector<16x256xf32>
    %128 = arith.mulf %124, %127 : vector<16x256xf32>
    %c2_53 = arith.constant 2 : index
    %c0_54 = arith.constant 0 : index
    %c0_55 = arith.constant 0 : index
    %129 = vector.load %arg7[%c2_53, %c0_54, %c0_55] : memref<9x16x16xbf16, #tpu.memory_space<vmem>>, vector<1x16x16xbf16>
    %130 = vector.shape_cast %129 : vector<1x16x16xbf16> to vector<16x16xbf16>
    %131 = arith.truncf %128 : vector<16x256xf32> to vector<16x256xbf16>
    %cst_56 = arith.constant dense<0.000000e+00> : vector<16x256xf32>
    %132 = tpu.matmul %130, %131, %cst_56 {dimension_numbers = #tpu.dot_dimension_numbers<[1], [0], [0], [1], [0, 0, 1, 1], [], []>} : vector<16x16xbf16>, vector<16x256xbf16>, vector<16x256xf32> -> vector<16x256xf32>
    %133 = arith.addf %123, %132 : vector<16x256xf32>
    %c1_i32_57 = arith.constant 1 : i32
    %134 = tpu.dynamic_rotate %102 by %c1_i32_57 dim 1 : vector<16x256xf32>, i32 -> vector<16x256xf32>
    %135 = vector.extract_strided_slice %2 {offsets = [3, 0, 0], sizes = [1, 1, 256], strides = [1, 1, 1]} : vector<9x1x256xf32> to vector<1x1x256xf32>
    %136 = vector.shape_cast %135 : vector<1x1x256xf32> to vector<1x256xf32>
    %137 = vector.broadcast %136 : vector<1x256xf32> to vector<16x256xf32>
    %138 = arith.mulf %134, %137 : vector<16x256xf32>
    %c3_58 = arith.constant 3 : index
    %c0_59 = arith.constant 0 : index
    %c0_60 = arith.constant 0 : index
    %139 = vector.load %arg7[%c3_58, %c0_59, %c0_60] : memref<9x16x16xbf16, #tpu.memory_space<vmem>>, vector<1x16x16xbf16>
    %140 = vector.shape_cast %139 : vector<1x16x16xbf16> to vector<16x16xbf16>
    %141 = arith.truncf %138 : vector<16x256xf32> to vector<16x256xbf16>
    %cst_61 = arith.constant dense<0.000000e+00> : vector<16x256xf32>
    %142 = tpu.matmul %140, %141, %cst_61 {dimension_numbers = #tpu.dot_dimension_numbers<[1], [0], [0], [1], [0, 0, 1, 1], [], []>} : vector<16x16xbf16>, vector<16x256xbf16>, vector<16x256xf32> -> vector<16x256xf32>
    %143 = arith.addf %133, %142 : vector<16x256xf32>
    %c4_62 = arith.constant 4 : index
    %c0_63 = arith.constant 0 : index
    %c0_64 = arith.constant 0 : index
    %144 = vector.load %arg7[%c4_62, %c0_63, %c0_64] : memref<9x16x16xbf16, #tpu.memory_space<vmem>>, vector<1x16x16xbf16>
    %145 = vector.shape_cast %144 : vector<1x16x16xbf16> to vector<16x16xbf16>
    %146 = arith.truncf %102 : vector<16x256xf32> to vector<16x256xbf16>
    %cst_65 = arith.constant dense<0.000000e+00> : vector<16x256xf32>
    %147 = tpu.matmul %145, %146, %cst_65 {dimension_numbers = #tpu.dot_dimension_numbers<[1], [0], [0], [1], [0, 0, 1, 1], [], []>} : vector<16x16xbf16>, vector<16x256xbf16>, vector<16x256xf32> -> vector<16x256xf32>
    %148 = arith.addf %143, %147 : vector<16x256xf32>
    %c255_i32_66 = arith.constant 255 : i32
    %149 = tpu.dynamic_rotate %102 by %c255_i32_66 dim 1 : vector<16x256xf32>, i32 -> vector<16x256xf32>
    %150 = vector.extract_strided_slice %2 {offsets = [5, 0, 0], sizes = [1, 1, 256], strides = [1, 1, 1]} : vector<9x1x256xf32> to vector<1x1x256xf32>
    %151 = vector.shape_cast %150 : vector<1x1x256xf32> to vector<1x256xf32>
    %152 = vector.broadcast %151 : vector<1x256xf32> to vector<16x256xf32>
    %153 = arith.mulf %149, %152 : vector<16x256xf32>
    %c5_67 = arith.constant 5 : index
    %c0_68 = arith.constant 0 : index
    %c0_69 = arith.constant 0 : index
    %154 = vector.load %arg7[%c5_67, %c0_68, %c0_69] : memref<9x16x16xbf16, #tpu.memory_space<vmem>>, vector<1x16x16xbf16>
    %155 = vector.shape_cast %154 : vector<1x16x16xbf16> to vector<16x16xbf16>
    %156 = arith.truncf %153 : vector<16x256xf32> to vector<16x256xbf16>
    %cst_70 = arith.constant dense<0.000000e+00> : vector<16x256xf32>
    %157 = tpu.matmul %155, %156, %cst_70 {dimension_numbers = #tpu.dot_dimension_numbers<[1], [0], [0], [1], [0, 0, 1, 1], [], []>} : vector<16x16xbf16>, vector<16x256xbf16>, vector<16x256xf32> -> vector<16x256xf32>
    %158 = arith.addf %148, %157 : vector<16x256xf32>
    %c241_i32_71 = arith.constant 241 : i32
    %159 = tpu.dynamic_rotate %102 by %c241_i32_71 dim 1 : vector<16x256xf32>, i32 -> vector<16x256xf32>
    %160 = vector.extract_strided_slice %2 {offsets = [6, 0, 0], sizes = [1, 1, 256], strides = [1, 1, 1]} : vector<9x1x256xf32> to vector<1x1x256xf32>
    %161 = vector.shape_cast %160 : vector<1x1x256xf32> to vector<1x256xf32>
    %162 = vector.broadcast %161 : vector<1x256xf32> to vector<16x256xf32>
    %163 = arith.mulf %159, %162 : vector<16x256xf32>
    %c6_72 = arith.constant 6 : index
    %c0_73 = arith.constant 0 : index
    %c0_74 = arith.constant 0 : index
    %164 = vector.load %arg7[%c6_72, %c0_73, %c0_74] : memref<9x16x16xbf16, #tpu.memory_space<vmem>>, vector<1x16x16xbf16>
    %165 = vector.shape_cast %164 : vector<1x16x16xbf16> to vector<16x16xbf16>
    %166 = arith.truncf %163 : vector<16x256xf32> to vector<16x256xbf16>
    %cst_75 = arith.constant dense<0.000000e+00> : vector<16x256xf32>
    %167 = tpu.matmul %165, %166, %cst_75 {dimension_numbers = #tpu.dot_dimension_numbers<[1], [0], [0], [1], [0, 0, 1, 1], [], []>} : vector<16x16xbf16>, vector<16x256xbf16>, vector<16x256xf32> -> vector<16x256xf32>
    %168 = arith.addf %158, %167 : vector<16x256xf32>
    %c240_i32_76 = arith.constant 240 : i32
    %169 = tpu.dynamic_rotate %102 by %c240_i32_76 dim 1 : vector<16x256xf32>, i32 -> vector<16x256xf32>
    %170 = vector.extract_strided_slice %2 {offsets = [7, 0, 0], sizes = [1, 1, 256], strides = [1, 1, 1]} : vector<9x1x256xf32> to vector<1x1x256xf32>
    %171 = vector.shape_cast %170 : vector<1x1x256xf32> to vector<1x256xf32>
    %172 = vector.broadcast %171 : vector<1x256xf32> to vector<16x256xf32>
    %173 = arith.mulf %169, %172 : vector<16x256xf32>
    %c7_77 = arith.constant 7 : index
    %c0_78 = arith.constant 0 : index
    %c0_79 = arith.constant 0 : index
    %174 = vector.load %arg7[%c7_77, %c0_78, %c0_79] : memref<9x16x16xbf16, #tpu.memory_space<vmem>>, vector<1x16x16xbf16>
    %175 = vector.shape_cast %174 : vector<1x16x16xbf16> to vector<16x16xbf16>
    %176 = arith.truncf %173 : vector<16x256xf32> to vector<16x256xbf16>
    %cst_80 = arith.constant dense<0.000000e+00> : vector<16x256xf32>
    %177 = tpu.matmul %175, %176, %cst_80 {dimension_numbers = #tpu.dot_dimension_numbers<[1], [0], [0], [1], [0, 0, 1, 1], [], []>} : vector<16x16xbf16>, vector<16x256xbf16>, vector<16x256xf32> -> vector<16x256xf32>
    %178 = arith.addf %168, %177 : vector<16x256xf32>
    %c239_i32_81 = arith.constant 239 : i32
    %179 = tpu.dynamic_rotate %102 by %c239_i32_81 dim 1 : vector<16x256xf32>, i32 -> vector<16x256xf32>
    %180 = vector.extract_strided_slice %2 {offsets = [8, 0, 0], sizes = [1, 1, 256], strides = [1, 1, 1]} : vector<9x1x256xf32> to vector<1x1x256xf32>
    %181 = vector.shape_cast %180 : vector<1x1x256xf32> to vector<1x256xf32>
    %182 = vector.broadcast %181 : vector<1x256xf32> to vector<16x256xf32>
    %183 = arith.mulf %179, %182 : vector<16x256xf32>
    %c8_82 = arith.constant 8 : index
    %c0_83 = arith.constant 0 : index
    %c0_84 = arith.constant 0 : index
    %184 = vector.load %arg7[%c8_82, %c0_83, %c0_84] : memref<9x16x16xbf16, #tpu.memory_space<vmem>>, vector<1x16x16xbf16>
    %185 = vector.shape_cast %184 : vector<1x16x16xbf16> to vector<16x16xbf16>
    %186 = arith.truncf %183 : vector<16x256xf32> to vector<16x256xbf16>
    %cst_85 = arith.constant dense<0.000000e+00> : vector<16x256xf32>
    %187 = tpu.matmul %185, %186, %cst_85 {dimension_numbers = #tpu.dot_dimension_numbers<[1], [0], [0], [1], [0, 0, 1, 1], [], []>} : vector<16x16xbf16>, vector<16x256xbf16>, vector<16x256xf32> -> vector<16x256xf32>
    %188 = arith.addf %178, %187 : vector<16x256xf32>
    %c0_86 = arith.constant 0 : index
    %c0_87 = arith.constant 0 : index
    %189 = vector.load %arg8[%c0_86, %c0_87] : memref<16x1xf32, #tpu.memory_space<vmem>>, vector<16x1xf32>
    %190 = vector.broadcast %189 : vector<16x1xf32> to vector<16x256xf32>
    %191 = arith.addf %188, %190 : vector<16x256xf32>
    %cst_88 = arith.constant 5.000000e-02 : f32
    %192 = vector.broadcast %cst_88 : f32 to vector<16x256xf32>
    %193 = arith.mulf %192, %191 : vector<16x256xf32>
    %194 = arith.maximumf %191, %193 : vector<16x256xf32>
    %195 = vector.extract_strided_slice %194 {offsets = [8, 0], sizes = [8, 256], strides = [1, 1]} : vector<16x256xf32> to vector<8x256xf32>
    %cst_89 = arith.constant 0.000000e+00 : f32
    %196 = vector.broadcast %cst_89 : f32 to vector<8x256xf32>
    %c17_i32_90 = arith.constant 17 : i32
    %197 = tpu.dynamic_rotate %195 by %c17_i32_90 dim 1 : vector<8x256xf32>, i32 -> vector<8x256xf32>
    %198 = vector.extract_strided_slice %2 {offsets = [0, 0, 0], sizes = [1, 1, 256], strides = [1, 1, 1]} : vector<9x1x256xf32> to vector<1x1x256xf32>
    %199 = vector.shape_cast %198 : vector<1x1x256xf32> to vector<1x256xf32>
    %200 = vector.broadcast %199 : vector<1x256xf32> to vector<8x256xf32>
    %201 = arith.mulf %197, %200 : vector<8x256xf32>
    %c0_91 = arith.constant 0 : index
    %c0_92 = arith.constant 0 : index
    %c0_93 = arith.constant 0 : index
    %202 = vector.load %arg9[%c0_91, %c0_92, %c0_93] : memref<9x8x8xbf16, #tpu.memory_space<vmem>>, vector<1x8x8xbf16>
    %203 = vector.shape_cast %202 : vector<1x8x8xbf16> to vector<8x8xbf16>
    %204 = arith.truncf %201 : vector<8x256xf32> to vector<8x256xbf16>
    %cst_94 = arith.constant dense<0.000000e+00> : vector<8x256xf32>
    %205 = tpu.matmul %203, %204, %cst_94 {dimension_numbers = #tpu.dot_dimension_numbers<[1], [0], [0], [1], [0, 0, 1, 1], [], []>} : vector<8x8xbf16>, vector<8x256xbf16>, vector<8x256xf32> -> vector<8x256xf32>
    %206 = arith.addf %196, %205 : vector<8x256xf32>
    %c16_i32_95 = arith.constant 16 : i32
    %207 = tpu.dynamic_rotate %195 by %c16_i32_95 dim 1 : vector<8x256xf32>, i32 -> vector<8x256xf32>
    %208 = vector.extract_strided_slice %2 {offsets = [1, 0, 0], sizes = [1, 1, 256], strides = [1, 1, 1]} : vector<9x1x256xf32> to vector<1x1x256xf32>
    %209 = vector.shape_cast %208 : vector<1x1x256xf32> to vector<1x256xf32>
    %210 = vector.broadcast %209 : vector<1x256xf32> to vector<8x256xf32>
    %211 = arith.mulf %207, %210 : vector<8x256xf32>
    %c1_96 = arith.constant 1 : index
    %c0_97 = arith.constant 0 : index
    %c0_98 = arith.constant 0 : index
    %212 = vector.load %arg9[%c1_96, %c0_97, %c0_98] : memref<9x8x8xbf16, #tpu.memory_space<vmem>>, vector<1x8x8xbf16>
    %213 = vector.shape_cast %212 : vector<1x8x8xbf16> to vector<8x8xbf16>
    %214 = arith.truncf %211 : vector<8x256xf32> to vector<8x256xbf16>
    %cst_99 = arith.constant dense<0.000000e+00> : vector<8x256xf32>
    %215 = tpu.matmul %213, %214, %cst_99 {dimension_numbers = #tpu.dot_dimension_numbers<[1], [0], [0], [1], [0, 0, 1, 1], [], []>} : vector<8x8xbf16>, vector<8x256xbf16>, vector<8x256xf32> -> vector<8x256xf32>
    %216 = arith.addf %206, %215 : vector<8x256xf32>
    %c15_i32_100 = arith.constant 15 : i32
    %217 = tpu.dynamic_rotate %195 by %c15_i32_100 dim 1 : vector<8x256xf32>, i32 -> vector<8x256xf32>
    %218 = vector.extract_strided_slice %2 {offsets = [2, 0, 0], sizes = [1, 1, 256], strides = [1, 1, 1]} : vector<9x1x256xf32> to vector<1x1x256xf32>
    %219 = vector.shape_cast %218 : vector<1x1x256xf32> to vector<1x256xf32>
    %220 = vector.broadcast %219 : vector<1x256xf32> to vector<8x256xf32>
    %221 = arith.mulf %217, %220 : vector<8x256xf32>
    %c2_101 = arith.constant 2 : index
    %c0_102 = arith.constant 0 : index
    %c0_103 = arith.constant 0 : index
    %222 = vector.load %arg9[%c2_101, %c0_102, %c0_103] : memref<9x8x8xbf16, #tpu.memory_space<vmem>>, vector<1x8x8xbf16>
    %223 = vector.shape_cast %222 : vector<1x8x8xbf16> to vector<8x8xbf16>
    %224 = arith.truncf %221 : vector<8x256xf32> to vector<8x256xbf16>
    %cst_104 = arith.constant dense<0.000000e+00> : vector<8x256xf32>
    %225 = tpu.matmul %223, %224, %cst_104 {dimension_numbers = #tpu.dot_dimension_numbers<[1], [0], [0], [1], [0, 0, 1, 1], [], []>} : vector<8x8xbf16>, vector<8x256xbf16>, vector<8x256xf32> -> vector<8x256xf32>
    %226 = arith.addf %216, %225 : vector<8x256xf32>
    %c1_i32_105 = arith.constant 1 : i32
    %227 = tpu.dynamic_rotate %195 by %c1_i32_105 dim 1 : vector<8x256xf32>, i32 -> vector<8x256xf32>
    %228 = vector.extract_strided_slice %2 {offsets = [3, 0, 0], sizes = [1, 1, 256], strides = [1, 1, 1]} : vector<9x1x256xf32> to vector<1x1x256xf32>
    %229 = vector.shape_cast %228 : vector<1x1x256xf32> to vector<1x256xf32>
    %230 = vector.broadcast %229 : vector<1x256xf32> to vector<8x256xf32>
    %231 = arith.mulf %227, %230 : vector<8x256xf32>
    %c3_106 = arith.constant 3 : index
    %c0_107 = arith.constant 0 : index
    %c0_108 = arith.constant 0 : index
    %232 = vector.load %arg9[%c3_106, %c0_107, %c0_108] : memref<9x8x8xbf16, #tpu.memory_space<vmem>>, vector<1x8x8xbf16>
    %233 = vector.shape_cast %232 : vector<1x8x8xbf16> to vector<8x8xbf16>
    %234 = arith.truncf %231 : vector<8x256xf32> to vector<8x256xbf16>
    %cst_109 = arith.constant dense<0.000000e+00> : vector<8x256xf32>
    %235 = tpu.matmul %233, %234, %cst_109 {dimension_numbers = #tpu.dot_dimension_numbers<[1], [0], [0], [1], [0, 0, 1, 1], [], []>} : vector<8x8xbf16>, vector<8x256xbf16>, vector<8x256xf32> -> vector<8x256xf32>
    %236 = arith.addf %226, %235 : vector<8x256xf32>
    %c4_110 = arith.constant 4 : index
    %c0_111 = arith.constant 0 : index
    %c0_112 = arith.constant 0 : index
    %237 = vector.load %arg9[%c4_110, %c0_111, %c0_112] : memref<9x8x8xbf16, #tpu.memory_space<vmem>>, vector<1x8x8xbf16>
    %238 = vector.shape_cast %237 : vector<1x8x8xbf16> to vector<8x8xbf16>
    %239 = arith.truncf %195 : vector<8x256xf32> to vector<8x256xbf16>
    %cst_113 = arith.constant dense<0.000000e+00> : vector<8x256xf32>
    %240 = tpu.matmul %238, %239, %cst_113 {dimension_numbers = #tpu.dot_dimension_numbers<[1], [0], [0], [1], [0, 0, 1, 1], [], []>} : vector<8x8xbf16>, vector<8x256xbf16>, vector<8x256xf32> -> vector<8x256xf32>
    %241 = arith.addf %236, %240 : vector<8x256xf32>
    %c255_i32_114 = arith.constant 255 : i32
    %242 = tpu.dynamic_rotate %195 by %c255_i32_114 dim 1 : vector<8x256xf32>, i32 -> vector<8x256xf32>
    %243 = vector.extract_strided_slice %2 {offsets = [5, 0, 0], sizes = [1, 1, 256], strides = [1, 1, 1]} : vector<9x1x256xf32> to vector<1x1x256xf32>
    %244 = vector.shape_cast %243 : vector<1x1x256xf32> to vector<1x256xf32>
    %245 = vector.broadcast %244 : vector<1x256xf32> to vector<8x256xf32>
    %246 = arith.mulf %242, %245 : vector<8x256xf32>
    %c5_115 = arith.constant 5 : index
    %c0_116 = arith.constant 0 : index
    %c0_117 = arith.constant 0 : index
    %247 = vector.load %arg9[%c5_115, %c0_116, %c0_117] : memref<9x8x8xbf16, #tpu.memory_space<vmem>>, vector<1x8x8xbf16>
    %248 = vector.shape_cast %247 : vector<1x8x8xbf16> to vector<8x8xbf16>
    %249 = arith.truncf %246 : vector<8x256xf32> to vector<8x256xbf16>
    %cst_118 = arith.constant dense<0.000000e+00> : vector<8x256xf32>
    %250 = tpu.matmul %248, %249, %cst_118 {dimension_numbers = #tpu.dot_dimension_numbers<[1], [0], [0], [1], [0, 0, 1, 1], [], []>} : vector<8x8xbf16>, vector<8x256xbf16>, vector<8x256xf32> -> vector<8x256xf32>
    %251 = arith.addf %241, %250 : vector<8x256xf32>
    %c241_i32_119 = arith.constant 241 : i32
    %252 = tpu.dynamic_rotate %195 by %c241_i32_119 dim 1 : vector<8x256xf32>, i32 -> vector<8x256xf32>
    %253 = vector.extract_strided_slice %2 {offsets = [6, 0, 0], sizes = [1, 1, 256], strides = [1, 1, 1]} : vector<9x1x256xf32> to vector<1x1x256xf32>
    %254 = vector.shape_cast %253 : vector<1x1x256xf32> to vector<1x256xf32>
    %255 = vector.broadcast %254 : vector<1x256xf32> to vector<8x256xf32>
    %256 = arith.mulf %252, %255 : vector<8x256xf32>
    %c6_120 = arith.constant 6 : index
    %c0_121 = arith.constant 0 : index
    %c0_122 = arith.constant 0 : index
    %257 = vector.load %arg9[%c6_120, %c0_121, %c0_122] : memref<9x8x8xbf16, #tpu.memory_space<vmem>>, vector<1x8x8xbf16>
    %258 = vector.shape_cast %257 : vector<1x8x8xbf16> to vector<8x8xbf16>
    %259 = arith.truncf %256 : vector<8x256xf32> to vector<8x256xbf16>
    %cst_123 = arith.constant dense<0.000000e+00> : vector<8x256xf32>
    %260 = tpu.matmul %258, %259, %cst_123 {dimension_numbers = #tpu.dot_dimension_numbers<[1], [0], [0], [1], [0, 0, 1, 1], [], []>} : vector<8x8xbf16>, vector<8x256xbf16>, vector<8x256xf32> -> vector<8x256xf32>
    %261 = arith.addf %251, %260 : vector<8x256xf32>
    %c240_i32_124 = arith.constant 240 : i32
    %262 = tpu.dynamic_rotate %195 by %c240_i32_124 dim 1 : vector<8x256xf32>, i32 -> vector<8x256xf32>
    %263 = vector.extract_strided_slice %2 {offsets = [7, 0, 0], sizes = [1, 1, 256], strides = [1, 1, 1]} : vector<9x1x256xf32> to vector<1x1x256xf32>
    %264 = vector.shape_cast %263 : vector<1x1x256xf32> to vector<1x256xf32>
    %265 = vector.broadcast %264 : vector<1x256xf32> to vector<8x256xf32>
    %266 = arith.mulf %262, %265 : vector<8x256xf32>
    %c7_125 = arith.constant 7 : index
    %c0_126 = arith.constant 0 : index
    %c0_127 = arith.constant 0 : index
    %267 = vector.load %arg9[%c7_125, %c0_126, %c0_127] : memref<9x8x8xbf16, #tpu.memory_space<vmem>>, vector<1x8x8xbf16>
    %268 = vector.shape_cast %267 : vector<1x8x8xbf16> to vector<8x8xbf16>
    %269 = arith.truncf %266 : vector<8x256xf32> to vector<8x256xbf16>
    %cst_128 = arith.constant dense<0.000000e+00> : vector<8x256xf32>
    %270 = tpu.matmul %268, %269, %cst_128 {dimension_numbers = #tpu.dot_dimension_numbers<[1], [0], [0], [1], [0, 0, 1, 1], [], []>} : vector<8x8xbf16>, vector<8x256xbf16>, vector<8x256xf32> -> vector<8x256xf32>
    %271 = arith.addf %261, %270 : vector<8x256xf32>
    %c239_i32_129 = arith.constant 239 : i32
    %272 = tpu.dynamic_rotate %195 by %c239_i32_129 dim 1 : vector<8x256xf32>, i32 -> vector<8x256xf32>
    %273 = vector.extract_strided_slice %2 {offsets = [8, 0, 0], sizes = [1, 1, 256], strides = [1, 1, 1]} : vector<9x1x256xf32> to vector<1x1x256xf32>
    %274 = vector.shape_cast %273 : vector<1x1x256xf32> to vector<1x256xf32>
    %275 = vector.broadcast %274 : vector<1x256xf32> to vector<8x256xf32>
    %276 = arith.mulf %272, %275 : vector<8x256xf32>
    %c8_130 = arith.constant 8 : index
    %c0_131 = arith.constant 0 : index
    %c0_132 = arith.constant 0 : index
    %277 = vector.load %arg9[%c8_130, %c0_131, %c0_132] : memref<9x8x8xbf16, #tpu.memory_space<vmem>>, vector<1x8x8xbf16>
    %278 = vector.shape_cast %277 : vector<1x8x8xbf16> to vector<8x8xbf16>
    %279 = arith.truncf %276 : vector<8x256xf32> to vector<8x256xbf16>
    %cst_133 = arith.constant dense<0.000000e+00> : vector<8x256xf32>
    %280 = tpu.matmul %278, %279, %cst_133 {dimension_numbers = #tpu.dot_dimension_numbers<[1], [0], [0], [1], [0, 0, 1, 1], [], []>} : vector<8x8xbf16>, vector<8x256xbf16>, vector<8x256xf32> -> vector<8x256xf32>
    %281 = arith.addf %271, %280 : vector<8x256xf32>
    %c0_134 = arith.constant 0 : index
    %c0_135 = arith.constant 0 : index
    %282 = vector.load %arg10[%c0_134, %c0_135] : memref<8x1xf32, #tpu.memory_space<vmem>>, vector<8x1xf32>
    %283 = vector.broadcast %282 : vector<8x1xf32> to vector<8x256xf32>
    %284 = arith.addf %281, %283 : vector<8x256xf32>
    %cst_136 = arith.constant 5.000000e-02 : f32
    %285 = vector.broadcast %cst_136 : f32 to vector<8x256xf32>
    %286 = arith.mulf %285, %284 : vector<8x256xf32>
    %287 = arith.maximumf %284, %286 : vector<8x256xf32>
    %288 = vector.extract_strided_slice %8 {offsets = [0, 0], sizes = [8, 256], strides = [1, 1]} : vector<32x256xf32> to vector<8x256xf32>
    %289 = vector.extract_strided_slice %101 {offsets = [0, 0], sizes = [8, 256], strides = [1, 1]} : vector<24x256xf32> to vector<8x256xf32>
    %290 = vector.extract_strided_slice %194 {offsets = [0, 0], sizes = [8, 256], strides = [1, 1]} : vector<16x256xf32> to vector<8x256xf32>
    %291 = tpu.concatenate %288, %289, %290, %287 in 0 : vector<8x256xf32>, vector<8x256xf32>, vector<8x256xf32>, vector<8x256xf32> -> vector<32x256xf32>
    %cst_137 = arith.constant dense<0.000000e+00> : vector<32xf32>
    %292 = vector.multi_reduction <add>, %291, %cst_137 [1] : vector<32x256xf32> to vector<32xf32>
    %293 = vector.shape_cast %292 : vector<32xf32> to vector<32x1xf32>
    %cst_138 = arith.constant 2.560000e+02 : f32
    %294 = vector.broadcast %cst_138 : f32 to vector<32x1xf32>
    %295 = arith.divf %293, %294 : vector<32x1xf32>
    %c0_139 = arith.constant 0 : index
    %c0_140 = arith.constant 0 : index
    %296 = vector.load %arg11[%c0_139, %c0_140] : memref<2x32xf32, #tpu.memory_space<vmem>>, vector<2x32xf32>
    %cst_141 = arith.constant dense<0.000000e+00> : vector<2x1xf32>
    %297 = tpu.matmul %296, %295, %cst_141 {dimension_numbers = #tpu.dot_dimension_numbers<[1], [0], [0], [1], [0, 0, 1, 1], [], []>} : vector<2x32xf32>, vector<32x1xf32>, vector<2x1xf32> -> vector<2x1xf32>
    %c0_142 = arith.constant 0 : index
    %c0_143 = arith.constant 0 : index
    %298 = vector.load %arg12[%c0_142, %c0_143] : memref<2x1xf32, #tpu.memory_space<vmem>>, vector<2x1xf32>
    %299 = arith.addf %297, %298 : vector<2x1xf32>
    %cst_144 = arith.constant 0.000000e+00 : f32
    %300 = vector.broadcast %cst_144 : f32 to vector<2x1xf32>
    %301 = arith.maximumf %299, %300 : vector<2x1xf32>
    %c0_145 = arith.constant 0 : index
    %c0_146 = arith.constant 0 : index
    %302 = vector.load %arg13[%c0_145, %c0_146] : memref<32x2xf32, #tpu.memory_space<vmem>>, vector<32x2xf32>
    %cst_147 = arith.constant dense<0.000000e+00> : vector<32x1xf32>
    %303 = tpu.matmul %302, %301, %cst_147 {dimension_numbers = #tpu.dot_dimension_numbers<[1], [0], [0], [1], [0, 0, 1, 1], [], []>} : vector<32x2xf32>, vector<2x1xf32>, vector<32x1xf32> -> vector<32x1xf32>
    %c0_148 = arith.constant 0 : index
    %c0_149 = arith.constant 0 : index
    %304 = vector.load %arg14[%c0_148, %c0_149] : memref<32x1xf32, #tpu.memory_space<vmem>>, vector<32x1xf32>
    %305 = arith.addf %303, %304 : vector<32x1xf32>
    %306 = arith.negf %305 : vector<32x1xf32>
    %307 = math.exp %306 : vector<32x1xf32>
    %cst_150 = arith.constant 1.000000e+00 : f32
    %308 = vector.broadcast %cst_150 : f32 to vector<32x1xf32>
    %309 = arith.addf %308, %307 : vector<32x1xf32>
    %310 = arith.divf %308, %309 : vector<32x1xf32>
    %311 = vector.broadcast %310 : vector<32x1xf32> to vector<32x256xf32>
    %312 = arith.mulf %291, %311 : vector<32x256xf32>
    %c0_151 = arith.constant 0 : index
    %c0_152 = arith.constant 0 : index
    %313 = vector.load %arg15[%c0_151, %c0_152] : memref<32x32xbf16, #tpu.memory_space<vmem>>, vector<32x32xbf16>
    %314 = arith.truncf %312 : vector<32x256xf32> to vector<32x256xbf16>
    %cst_153 = arith.constant dense<0.000000e+00> : vector<32x256xf32>
    %315 = tpu.matmul %313, %314, %cst_153 {dimension_numbers = #tpu.dot_dimension_numbers<[1], [0], [0], [1], [0, 0, 1, 1], [], []>} : vector<32x32xbf16>, vector<32x256xbf16>, vector<32x256xf32> -> vector<32x256xf32>
    %c0_154 = arith.constant 0 : index
    %c0_155 = arith.constant 0 : index
    %316 = vector.load %arg16[%c0_154, %c0_155] : memref<32x1xf32, #tpu.memory_space<vmem>>, vector<32x1xf32>
    %317 = vector.broadcast %316 : vector<32x1xf32> to vector<32x256xf32>
    %318 = arith.addf %315, %317 : vector<32x256xf32>
    %319 = arith.addf %318, %1 : vector<32x256xf32>
    %c0_156 = arith.constant 0 : index
    %c0_157 = arith.constant 0 : index
    %c0_158 = arith.constant 0 : index
    %320 = vector.load %arg17[%c0_156, %c0_157, %c0_158] : memref<1x32x256xf32, #tpu.memory_space<vmem>>, vector<1x32x256xf32>
    %321 = vector.shape_cast %320 : vector<1x32x256xf32> to vector<32x256xf32>
    %322 = vector.shape_cast %319 : vector<32x256xf32> to vector<1x32x256xf32>
    tpu.vector_store %arg17[%c0_156, %c0_157, %c0_158], %322 {strides = array<i32>} : memref<1x32x256xf32, #tpu.memory_space<vmem>>, vector<1x32x256xf32>,
    return
  }
  func.func @transform_0(%arg0: i32) -> (i32, i32, i32) {
    %c0_i32 = arith.constant 0 : i32
    %c0_i32_0 = arith.constant 0 : i32
    %c0_i32_1 = arith.constant 0 : i32
    return %arg0, %c0_i32, %c0_i32_0 : i32, i32, i32
  }
  func.func @transform_1(%arg0: i32) -> (i32, i32, i32) {
    %c0_i32 = arith.constant 0 : i32
    %c0_i32_0 = arith.constant 0 : i32
    %c0_i32_1 = arith.constant 0 : i32
    %c0_i32_2 = arith.constant 0 : i32
    return %c0_i32, %c0_i32_0, %c0_i32_1 : i32, i32, i32
  }
  func.func @transform_2(%arg0: i32) -> (i32, i32) {
    %c0_i32 = arith.constant 0 : i32
    %c0_i32_0 = arith.constant 0 : i32
    %c0_i32_1 = arith.constant 0 : i32
    return %c0_i32, %c0_i32_0 : i32, i32
  }
  func.func @transform_3(%arg0: i32) -> (i32, i32) {
    %c0_i32 = arith.constant 0 : i32
    %c0_i32_0 = arith.constant 0 : i32
    %c0_i32_1 = arith.constant 0 : i32
    return %c0_i32, %c0_i32_0 : i32, i32
  }
  func.func @transform_4(%arg0: i32) -> (i32, i32, i32) {
    %c0_i32 = arith.constant 0 : i32
    %c0_i32_0 = arith.constant 0 : i32
    %c0_i32_1 = arith.constant 0 : i32
    %c0_i32_2 = arith.constant 0 : i32
    return %c0_i32, %c0_i32_0, %c0_i32_1 : i32, i32, i32
  }
  func.func @transform_5(%arg0: i32) -> (i32, i32) {
    %c0_i32 = arith.constant 0 : i32
    %c0_i32_0 = arith.constant 0 : i32
    %c0_i32_1 = arith.constant 0 : i32
    return %c0_i32, %c0_i32_0 : i32, i32
  }
  func.func @transform_6(%arg0: i32) -> (i32, i32, i32) {
    %c0_i32 = arith.constant 0 : i32
    %c0_i32_0 = arith.constant 0 : i32
    %c0_i32_1 = arith.constant 0 : i32
    %c0_i32_2 = arith.constant 0 : i32
    return %c0_i32, %c0_i32_0, %c0_i32_1 : i32, i32, i32
  }
  func.func @transform_7(%arg0: i32) -> (i32, i32) {
    %c0_i32 = arith.constant 0 : i32
    %c0_i32_0 = arith.constant 0 : i32
    %c0_i32_1 = arith.constant 0 : i32
    return %c0_i32, %c0_i32_0 : i32, i32
  }
  func.func @transform_8(%arg0: i32) -> (i32, i32, i32) {
    %c0_i32 = arith.constant 0 : i32
    %c0_i32_0 = arith.constant 0 : i32
    %c0_i32_1 = arith.constant 0 : i32
    %c0_i32_2 = arith.constant 0 : i32
    return %c0_i32, %c0_i32_0, %c0_i32_1 : i32, i32, i32
  }
  func.func @transform_9(%arg0: i32) -> (i32, i32) {
    %c0_i32 = arith.constant 0 : i32
    %c0_i32_0 = arith.constant 0 : i32
    %c0_i32_1 = arith.constant 0 : i32
    return %c0_i32, %c0_i32_0 : i32, i32
  }
  func.func @transform_10(%arg0: i32) -> (i32, i32) {
    %c0_i32 = arith.constant 0 : i32
    %c0_i32_0 = arith.constant 0 : i32
    %c0_i32_1 = arith.constant 0 : i32
    return %c0_i32, %c0_i32_0 : i32, i32
  }
  func.func @transform_11(%arg0: i32) -> (i32, i32) {
    %c0_i32 = arith.constant 0 : i32
    %c0_i32_0 = arith.constant 0 : i32
    %c0_i32_1 = arith.constant 0 : i32
    return %c0_i32, %c0_i32_0 : i32, i32
  }
  func.func @transform_12(%arg0: i32) -> (i32, i32) {
    %c0_i32 = arith.constant 0 : i32
    %c0_i32_0 = arith.constant 0 : i32
    %c0_i32_1 = arith.constant 0 : i32
    return %c0_i32, %c0_i32_0 : i32, i32
  }
  func.func @transform_13(%arg0: i32) -> (i32, i32) {
    %c0_i32 = arith.constant 0 : i32
    %c0_i32_0 = arith.constant 0 : i32
    %c0_i32_1 = arith.constant 0 : i32
    return %c0_i32, %c0_i32_0 : i32, i32
  }
  func.func @transform_14(%arg0: i32) -> (i32, i32) {
    %c0_i32 = arith.constant 0 : i32
    %c0_i32_0 = arith.constant 0 : i32
    %c0_i32_1 = arith.constant 0 : i32
    return %c0_i32, %c0_i32_0 : i32, i32
  }
  func.func @transform_15(%arg0: i32) -> (i32, i32) {
    %c0_i32 = arith.constant 0 : i32
    %c0_i32_0 = arith.constant 0 : i32
    %c0_i32_1 = arith.constant 0 : i32
    return %c0_i32, %c0_i32_0 : i32, i32
  }
  func.func @transform_16(%arg0: i32) -> (i32, i32, i32) {
    %c0_i32 = arith.constant 0 : i32
    %c0_i32_0 = arith.constant 0 : i32
    %c0_i32_1 = arith.constant 0 : i32
    return %arg0, %c0_i32, %c0_i32_0 : i32, i32, i32
  }
}

</mosaic_0001>

<bundles_post_ra>
// kernel: tpu_custom_call.1
= control target key start
LH: loop header
LB: loop body
LE: loop exit
PB: predicated region body
PF: predicated region fallthrough
CT: control target
= control target key end

     0   :  { %s5311_s0 = inlined_call_operand.vmem [shape: f32[2,32,256], index: 0, kind: input, shape index: {}]   ;;  %s5312_s1 = inlined_call_operand.hbm [shape: f32[9,1,256], index: 1, kind: input, shape index: {}]   ;;  %s5313_s2 = inlined_call_operand.hbm [shape: bf16[32,32], index: 2, kind: input, shape index: {}]   ;;  %s5314_s3 = inlined_call_operand.vmem [shape: f32[32,1], index: 3, kind: input, shape index: {}]   ;;  %s5315_s4 = inlined_call_operand.vmem [shape: bf16[9,24,24], index: 4, kind: input, shape index: {}]   ;;  %s5316_s5 = inlined_call_operand.vmem [shape: f32[24,1], index: 5, kind: input, shape index: {}]   ;;  %s5317_s6 = inlined_call_operand.hbm [shape: bf16[9,16,16], index: 6, kind: input, shape index: {}]   ;;  %s5318_s7 = inlined_call_operand.vmem [shape: f32[16,1], index: 7, kind: input, shape index: {}]   ;;  %s5319_s8 = inlined_call_operand.vmem [shape: bf16[9,8,8], index: 8, kind: input, shape index: {}]   ;;  %s5320_s9 = inlined_call_operand.vmem [shape: f32[8,1], index: 9, kind: input, shape index: {}]   ;;  %s5321_s10 = inlined_call_operand.vmem [shape: f32[2,32], index: 10, kind: input, shape index: {}]   ;;  %s5322_s11 = inlined_call_operand.vmem [shape: f32[2,1], index: 11, kind: input, shape index: {}]   ;;  %s5323_s12 = inlined_call_operand.vmem [shape: f32[32,2], index: 12, kind: input, shape index: {}]   ;;  %s5324_s13 = inlined_call_operand.vmem [shape: f32[32,1], index: 13, kind: input, shape index: {}]   ;;  %s5325_s14 = inlined_call_operand.vmem [shape: bf16[32,32], index: 14, kind: input, shape index: {}]   ;;  %s5326_s15 = inlined_call_operand.vmem [shape: f32[32,1], index: 15, kind: input, shape index: {}]   ;;  %s5327_s16 = inlined_call_operand.hbm [shape: f32[2,32,256], index: 16, kind: output, shape index: {}]  }
   0x1   :  { %5345 = sst [smem:[#allocation20_spill]] %s5311_s0 }
   0x2   :  { %5346 = sst [smem:[#allocation21_spill]] %s5313_s2 }
   0x3   :  { %5347 = sst [smem:[#allocation22_spill]] %s5325_s14 }
   0x4   :  { %5348 = sst [smem:[#allocation23_spill]] %s5327_s16 }
   0x5   :  { %21 = vsyncpa [#allocation3], 0 }
   0x6   :  { %22 = vsyncpa [#allocation6], 0 }
   0x7   :  { %23 = vsyncpa [#allocation4], 0 }
   0x8   :  { %25 = vsyncpa [#allocation4 + $0x1], 0  ;;  %s4162_s21 = smov 0   ;;  %s4164_s22 = smov 0  }
   0x9   :  { %s4166_s23 = smov 0   ;;  %s4168_s24 = smov 0  }
   0xa LB: > { %5349 = sst [smem:[#allocation12_spill]] %s4042_s21  ;;  %s4183_s25 = sadd.s32 4294967295, %s4054_s24   ;;  %s4054_s24 = sphi %s4168_s24, %s5380_s24   ;;  %s4050_s23 = sphi %s4166_s23, %s5383_s23   ;;  %s4046_s22 = sphi %s4164_s22, %s5382_s22   ;;  %s4042_s21 = sphi %s4162_s21, %s5381_s21  }
   0xb   : > { %5350 = sst [smem:[#allocation13_spill]] %s4046_s22  ;;  %s3502_s26 = sadd.s32 4294967294, %s4054_s24  }
   0xc   : > { %5351 = sst [smem:[#allocation14_spill]] %s4050_s23  ;;  %s4187_s27 = sadd.s32 1, %s4054_s24  }
   0xd   : > { %5352 = sst [smem:[#allocation15_spill]] %s4054_s24  ;;  %s379_s28 = sadd.s32 1, %s4050_s23 }
   0xe   : > { %5353 = sst [smem:[#allocation16_spill]] %s4187_s27  ;;  %s376_s29 = ssub.s32 %s4054_s24, %s4187_s27 }
   0xf   : > { %p389_p0 = scmp.ne.s32.totalorder %s4050_s23, %s4046_s22  ;;  %p377_p1 = scmp.eq.s32.totalorder %s376_s29, 0 }
  0x10   : > { %p390_p2 = scmp.eq.s32.totalorder %s4183_s25, 1  ;;  %p395_p3 = scmp.ne.s32.totalorder %s4046_s22, %s4042_s21 }
  0x11   : > { %p396_p4 = scmp.eq.s32.totalorder %s3502_s26, 1  ;;  %p3503_p7 = scmp.ge.s32.totalorder %s4054_s24, 1 }
  0x12   : > { %s4198_s30 = scalar_select %p377_p1, %s4050_s23, %s379_s28  }
  0x13   : > { %p4200_p5 = por %p390_p2, %p389_p0  ;;  %p4204_p6 = por %p396_p4, %p395_p3 }
  0x14   : > { %5354 = sst [smem:[#allocation17_spill]] %s4198_s30  ;;  %p403_p8 = scmp.lt.s32.totalorder %s4054_s24, 3 }
  0x15   : > { %s5355_s0 = scalar_select %p4200_p5, 1, 0 }
  0x16   : > { %s5357_s17 = scalar_select %p4204_p6, 1, 0 }
  0x17   : > { %5356 = sst [smem:[#allocation18_spill]] %s5355_s0  ;;  %p5334_p9 = scmp.eq.s32.totalorder %s4183_s25, 0 }
  0x18   : > { %5358 = sst [smem:[#allocation19_spill]] %s5357_s17  ;;  %p4211_p10 = pnand %p3503_p7, %p403_p8 }
  0x19   : > { %s4056_s19 = smov [#allocation5]   ;;  %s4057_s28 = smov [#allocation2]  }
  0x1a   : > { %s5359_s18 = scalar_select %p4211_p10, 1, 0 }
  0x1b   : > { %s428_s20 = sshll.u32 %s4056_s19, 4  ;;  %p3770_p11 = pneg %p4211_p10  ;;  %s429_s20 = int_to_ptr.vmem [resolvable:$true] %s428_s20 }
  0x1c   : > { %s415_s29 = sshll.u32 %s4057_s28, 4  ;;  %s5361_s2 = sld [smem:[#allocation21_spill]]  ;;  %s4223_s29 = int_to_ptr.vmem [resolvable:$true] %s415_s29 }
  0x1d   : > { %p4219_p12 = pnand %p5334_p9, %p3770_p11 }
  0x1f   : > { %p4233_p0 = pneg %p4219_p12 }
  0x22   : > { %s3900_s27 = scalar_lea.hbm %s5361_s2, 256 }
  0x23   : > { %p3901_p13 = scmp.ne.s32.totalorder %s5361_s2, %s3900_s27  ;;  %p3907_p3 = scmp.lt.u32.totalorder %s3900_s27, %s5361_s2 }
  0x25   : > { %p3903_p1 = pnand %p4233_p0, %p3901_p13 }
  0x27   : > { %p3904_p2 = pneg %p3903_p1 }
  0x29   : > { %p3909_p4 = pnand %p3907_p3, %p3904_p2 }
  0x2b   : > { %3912 = shalt.err (!%p3909_p4)
}
  0x2c   : > { %s3913_s23 = scalar_lea.vmem %s429_s20, 256  ;;  %p3921_p9 = scmp.lt.s32.totalorder %s429_s20, %s429_s20 }
  0x2d   : > { %p3914_p7 = scmp.ne.s32.totalorder %s429_s20, %s3913_s23  ;;  %p3922_p6 = scmp.lt.s32.totalorder %s3913_s23, %s3913_s23 }
  0x2f   : > { %p3916_p8 = pnand %p3914_p7, %p4233_p0  ;;  %p3923_p5 = por %p3922_p6, %p3921_p9 }
  0x31   : > { %p3917_p11 = pneg %p3916_p8 }
  0x33   : > { %p3924_p10 = pnand %p3923_p5, %p3917_p11 }
  0x35   : > { %3927 = shalt.err (!%p3924_p10)
}
  0x36   : > { %s5343_s21 = smov 64   ;;  %s5344_s30 = smov 4  }
  0x37   : > { %3776 = dma.hbm_to_vmem [thread:$0]  (!%p4219_p12), %s5361_s2, 256, %s429_s20, [#allocation6], %s5343_s21, %s5343_s21, %s5344_s30  }
  0x38   : > { %s3928_s16 = scalar_lea.hbm %s5312_s1, 288 }
  0x39   : > { %p3929_p5 = scmp.ne.s32.totalorder %s5312_s1, %s3928_s16  ;;  %p3935_p10 = scmp.lt.u32.totalorder %s3928_s16, %s5312_s1 }
  0x3b   : > { %p3931_p6 = pnand %p3929_p5, %p4233_p0 }
  0x3d   : > { %p3932_p9 = pneg %p3931_p6 }
  0x3f   : > { %p3937_p13 = pnand %p3935_p10, %p3932_p9 }
  0x41   : > { %3940 = shalt.err (!%p3937_p13)
}
  0x42   : > { %s3941_s20 = scalar_lea.vmem %s4223_s29, 288  ;;  %p3949_p4 = scmp.lt.s32.totalorder %s4223_s29, %s4223_s29 }
  0x43   : > { %p3942_p1 = scmp.ne.s32.totalorder %s4223_s29, %s3941_s20  ;;  %p3950_p7 = scmp.lt.s32.totalorder %s3941_s20, %s3941_s20 }
  0x45   : > { %p3944_p2 = pnand %p3942_p1, %p4233_p0  ;;  %p3951_p8 = por %p3950_p7, %p3949_p4 }
  0x47   : > { %p3945_p3 = pneg %p3944_p2 }
  0x49   : > { %p3952_p11 = pnand %p3951_p8, %p3945_p3 }
  0x4b   : > { %3955 = shalt.err (!%p3952_p11)
}
  0x4c   : > { %s4060_s0 = smov 32   ;;  %s4061_s14 = smov 2  }
  0x4d   : > { %3773 = dma.hbm_to_vmem [thread:$0]  (!%p4219_p12), %s5312_s1, 288, %s4223_s29, [#allocation3], %s4060_s0, %s4060_s0, %s4061_s14  }
  0x4e   : > { %s4062_s24 = smov [#allocation7]   ;;  %s3956_s23 = scalar_lea.hbm %s5317_s6, 1152 }
  0x4f   : > { %s450_s27 = sshll.u32 %s4062_s24, 4  ;;  %p3957_p5 = scmp.ne.s32.totalorder %s5317_s6, %s3956_s23  ;;  %s451_s27 = int_to_ptr.vmem [resolvable:$true] %s450_s27 }
  0x50   : > { %p3963_p10 = scmp.lt.u32.totalorder %s3956_s23, %s5317_s6 }
  0x51   : > { %p3959_p6 = pnand %p3957_p5, %p4233_p0 }
  0x53   : > { %p3960_p9 = pneg %p3959_p6 }
  0x55   : > { %p3965_p13 = pnand %p3963_p10, %p3960_p9 }
  0x57   : > { %3968 = shalt.err (!%p3965_p13)
}
  0x58   : > { %s3969_s29 = scalar_lea.vmem %s451_s27, 1152  ;;  %p3977_p4 = scmp.lt.s32.totalorder %s451_s27, %s451_s27 }
  0x59   : > { %p3970_p1 = scmp.ne.s32.totalorder %s451_s27, %s3969_s29  ;;  %p3978_p7 = scmp.lt.s32.totalorder %s3969_s29, %s3969_s29 }
  0x5b   : > { %p3972_p2 = pnand %p3970_p1, %p4233_p0  ;;  %p3979_p8 = por %p3978_p7, %p3977_p4 }
  0x5d   : > { %p3973_p3 = pneg %p3972_p2 }
  0x5f   : > { %p3980_p11 = pnand %p3979_p8, %p3973_p3 }
  0x61   : > { %3983 = shalt.err (!%p3980_p11)
}
  0x62   : > { %s5363_s21 = smov 4   ;;  %s5364_s0 = smov 64  }
  0x63   : > { %3779 = dma.hbm_to_vmem [thread:$0]  (!%p4219_p12), %s5317_s6, 1152, %s451_s27, [#allocation6], %s5364_s0, %s5364_s0, %s5363_s21  }
  0x64   : > { %p5365_p5 = scmp.ne.s32.totalorder %s5359_s18, 0 }
  0x65   : > { %p5366_p0 = scmp.eq.s32.totalorder (!%p5365_p5), %s4183_s25, 0 }
  0x66   : > { %501 = sbr.rel (%p5365_p5) target bundleno = 2679 (0xa77), region = 84 }
  0x6d   : > { %4029 = dma.done.wait (%p5366_p0), [#allocation3], 288   ;;  %p5367_p6 = pmov %p5366_p0 }
  0x6e   : > { %p5368_p9 = pmov %p5366_p0 }
  0x6f   : > { %4031 = vsyncadd (%p5367_p6), [#allocation3], 4294967008 }
  0x70   : > { %4033 = dma.done.wait (%p5368_p9), [#allocation6], 1408   ;;  %p5369_p10 = pmov %p5366_p0 }
  0x71   : > { %p559_p13 = scmp.lt.s32.totalorder %s4183_s25, 1  ;;  %v4063_v0 = vmov 0   ;;  %s5370_s16 = sld [smem:[#allocation20_spill]]  ;;  %v590_v13 = vld [vmem:[%s5314_s3 + $0x8] sm:$0xff]  ;;  %v3845_v14 = vld [vmem:[#allocation5] sm:$0xff]   ;;  %vm623_vm0 = vcmask 261120   ;;  %v695_v37 = vlaneseq }
  0x72   : > { %4035 = vsyncadd (%p5369_p10), [#allocation6], 4294965888  ;;  %662 = vmatprep.mubr.bf16.mxu0 %v4063_v0  ;;  %672 = vmatprep.mubr.bf16.mxu1 %v4063_v0  ;;  %v3846_v15 = vld [vmem:[#allocation5 + $0x8] sm:$0xff]   ;;  %v591_v16 = vld [vmem:[%s5314_s3 + $0x10] sm:$0xff]  ;;  %s4064_s29 = smov 16   ;;  %s4065_s21 = smov 17  }
  0x73   : > { %s560_s18 = scalar_select %p559_p13, %s4183_s25, 1  ;;  %3843 = vset.pattern.permute.xlu0 %v4063_v0  ;;  %3844 = vset.pattern.permute.xlu1 %v4063_v0  ;;  %v592_v17 = vld [vmem:[%s5314_s3 + $0x18] sm:$0xff]  ;;  %v1729_v35 = vld [vmem:[%s5316_s5 + $0x10] sm:$0xff]  ;;  %v1728_v36 = vld [vmem:[%s5316_s5 + $0x8] sm:$0xff]  ;;  %v706_v38 = vshrl.u32 %v695_v37, 7  ;;  %v4456_v39 = vand.u32 127, %v695_v37 }
  0x74   : > { %600 = vperm.xlu0 %3843, %v590_v13   ;;  %610 = vperm.xlu1 %3844, %v592_v17   ;;  %s4066_s0 = smov 15   ;;  %s4067_s2 = smov 1   ;;  %v574_v43 = vld [vmem:[#allocation2 + $0x2] sm:$0x3]  ;;  %vm787_vm3 = vcmask 1043456   ;;  %vm780_vm4 = vcmask 195584  }
  0x75   : > { %s3651_s26 = sshll.u32 %s560_s18, 6  ;;  %s4068_s30 = smov 127   ;;  %v4458_v41 = vsub.s32 0, %v706_v38  ;;  %v4460_v42 = vsub.s32 1, %v706_v38  ;;  %vm740_vm1 = vcmp.lt.s32.totalorder %v4456_v39, 16  ;;  %vm697_vm2 = vcmp.lt.s32.totalorder %v4456_v39, 17 }
  0x76   : > { %s4069_s18 = smov 113   ;;  %s4071_s19 = smov 111   ;;  %v3848_v38 = vld [vmem:[%s5315_s4 + $0x14] ss:$0 sps:$4 sm:$0xff]   ;;  %vm928_vm5 = vcmp.lt.s32.totalorder %v4456_v39, 15  ;;  %vm1049_vm6 = vcmp.lt.s32.totalorder %v4456_v39, 1 }
  0x77   : > { %s4315_s22 = scalar_lea.vmem %s5370_s16, %s3651_s26  ;;  %s4070_s26 = smov 112   ;;  %v4464_v45 = vrot.slane %v574_v43, %v4458_v41  ;;  %v4467_v46 = vrot.slane %v574_v43, %v4460_v42  ;;  %vm1255_vm7 = vcmp.lt.s32.totalorder %v4456_v39, 127  ;;  %vm1376_vm8 = vcmp.lt.s32.totalorder %v4456_v39, 113 }
  0x78   : > { %v566_v1 = vld [vmem:[%s4315_s22 + $0x8] sm:$0xff]  ;;  %v568_v2 = vld [vmem:[%s4315_s22 + $0x18] sm:$0xff]  ;;  %v565_v3 = vld [vmem:[%s4315_s22] sm:$0xff]  ;;  %605 = vperm.xlu0 %3843, %v591_v16   ;;  %vm1497_vm9 = vcmp.lt.s32.totalorder %v4456_v39, 112  ;;  %vm1618_vm10 = vcmp.lt.s32.totalorder %v4456_v39, 111  ;;  %vm1809_vm11 = vcmask 130048  }
  0x79   : > { %v586_v4 = vpack.c.bf16 %v568_v2, %v566_v1  ;;  %v567_v5 = vld [vmem:[%s4315_s22 + $0x10] sm:$0xff]  ;;  %v570_v6 = vld [vmem:[%s4315_s22 + $0x28] sm:$0xff]  ;;  %v572_v7 = vld [vmem:[%s4315_s22 + $0x38] sm:$0xff]  ;;  %vm2470_vm12 = vcmask 64512   ;;  %vm4073_vm13 = vmmov 0   ;;  %vm3124_vm14 = vcmask 15360  }
  0x7a   : > { %v585_v8 = vpack.c.bf16 %v567_v5, %v565_v3  ;;  %v588_v9 = vpack.c.bf16 %v572_v7, %v570_v6  ;;  %v569_v10 = vld [vmem:[%s4315_s22 + $0x20] sm:$0xff]  ;;  %v571_v11 = vld [vmem:[%s4315_s22 + $0x30] sm:$0xff]  ;;  %vm3137_vm15 = vcmask 1041408   ;;  %s5371_s17 = sld [smem:[#allocation13_spill]]  ;;  %s5372_s20 = sld [smem:[#allocation22_spill]] }
  0x7b   : > { %630 = vmatprep.subr.bf16.mxu0 %v586_v4  ;;  %3688 = vmatprep.subr.bf16.mxu1 %v586_v4  ;;  %v587_v12 = vpack.c.bf16 %v571_v11, %v569_v10  ;;  %v573_v3 = vld [vmem:[#allocation2] sm:$0x3]  ;;  %v3847_v11 = vld [vmem:[%s5315_s4 + $0xc] sm:$0xff]   ;;  %s5373_s24 = sld [smem:[#allocation18_spill]]  ;;  %s4075_s14 = smov [#allocation8]  }
  0x7c   : > { %631 = vmatpush1.bf16.msra.mxu0 %v585_v8  ;;  %3690 = vmatpush1.bf16.msra.mxu1 %v585_v8  ;;  %v4489_v7 = vrot.slane %v573_v3, %v4458_v41  ;;  %v4492_v8 = vrot.slane %v573_v3, %v4460_v42  ;;  %s3988_s16 = sshll.u32 %s4075_s14, 4  ;;  %s3989_s16 = int_to_ptr.vmem [resolvable:$false] %s3988_s16 }
  0x7d   : > { %632 = vmatprep.subr.bf16.mxu0 %v588_v9  ;;  %3689 = vmatprep.subr.bf16.mxu1 %v588_v9 }
  0x80   : > { %633 = vmatpush1.bf16.msra.mxu0 %v587_v12  ;;  %3691 = vmatpush1.bf16.msra.mxu1 %v587_v12 }
  0x81   : > { %p5375_p1 = scmp.ne.s32.totalorder %s5373_s24, 0 }
  0x83   : > { %3517 = vmatmul.mubr.msk.bf16.vlgmr.msra.gmra.mrb[0].mxu0 %vm623_vm0, %v3845_v14  ;;  %3518 = vmatmul.mubr.msk.bf16.vlgmr.msra.gmra.mrb[0].mxu1 %vm623_vm0, %v3846_v15 }
  0x84   : > { %826 = vmatprep.mubr.bf16.mxu1 %v4063_v0  ;;  %1845 = vmatprep.mubr.bf16.mxu0 %v4063_v0 }
  0xf3   : > { %v601_v18 = vpop.permute.xlu0 %600  ;;  %v611_v31 = vpop.permute.xlu1 %610 }
  0xf7   : > { %v606_v19 = vpop.permute.xlu0 %605 }
 0x156   : > { %v4338_v20 = vpop.f32.mrb[0].mxu0  ;;  %v674_v21 = vpop.f32.mrb[0].mxu1 }
 0x157   : > { %v4340_v22 = vadd.f32 %v674_v21, %v606_v19  ;;  %v4342_v23 = vpop.f32.mrb[1].mxu0  ;;  %v676_v24 = vpop.f32.mrb[1].mxu1 }
 0x158   : > { %v668_v25 = vpop.f32.mrb[2].mxu0  ;;  %v678_v26 = vpop.f32.mrb[2].mxu1  ;;  %v4348_v30 = vadd.f32 %v676_v24, %v606_v19 }
 0x159   : > { %v4344_v27 = vadd.f32 %v668_v25, %v601_v18  ;;  %v680_v28 = vpop.f32.mrb[3].mxu1  ;;  %730 = vrot.lane.b32.xlu0 %v4340_v22, %s4064_s29  ;;  %v670_v29 = vpop.f32.mrb[3].mxu0  ;;  %v4360_v34 = vadd.f32 %v678_v26, %v611_v31 }
 0x15a   : > { %v4352_v32 = vadd.f32 %v670_v29, %v601_v18  ;;  %v4356_v33 = vadd.f32 %v680_v28, %v611_v31 }
 0x15b   : > { %728 = vrot.lane.b32.xlu1 %v4344_v27, %s4064_s29 }
 0x15d   : > { %736 = vrot.lane.b32.xlu0 %v4348_v30, %s4064_s29 }
 0x15f   : > { %734 = vrot.lane.b32.xlu1 %v4352_v32, %s4064_s29 }
 0x161   : > { %738 = vrot.lane.b32.xlu0 %v4356_v33, %s4064_s29 }
 0x163   : > { %732 = vrot.lane.b32.xlu1 %v4360_v34, %s4064_s29 }
 0x165   : > { %685 = vrot.lane.b32.xlu0 %v4340_v22, %s4065_s21 }
 0x167   : > { %683 = vrot.lane.b32.xlu1 %v4344_v27, %s4065_s21 }
 0x169   : > { %691 = vrot.lane.b32.xlu0 %v4348_v30, %s4065_s21 }
 0x16b   : > { %689 = vrot.lane.b32.xlu1 %v4352_v32, %s4065_s21 }
 0x16d   : > { %693 = vrot.lane.b32.xlu0 %v4356_v33, %s4065_s21 }
 0x16f   : > { %687 = vrot.lane.b32.xlu1 %v4360_v34, %s4065_s21 }
 0x171   : > { %918 = vrot.lane.b32.xlu0 %v4340_v22, %s4066_s0 }
 0x173   : > { %916 = vrot.lane.b32.xlu1 %v4344_v27, %s4066_s0 }
 0x175   : > { %924 = vrot.lane.b32.xlu0 %v4348_v30, %s4066_s0 }
 0x177   : > { %922 = vrot.lane.b32.xlu1 %v4352_v32, %s4066_s0 }
 0x179   : > { %926 = vrot.lane.b32.xlu0 %v4356_v33, %s4066_s0 }
 0x17b   : > { %920 = vrot.lane.b32.xlu1 %v4360_v34, %s4066_s0 }
 0x17d   : > { %1039 = vrot.lane.b32.xlu0 %v4340_v22, %s4067_s2 }
 0x17f   : > { %1037 = vrot.lane.b32.xlu1 %v4344_v27, %s4067_s2 }
 0x181   : > { %1045 = vrot.lane.b32.xlu0 %v4348_v30, %s4067_s2 }
 0x183   : > { %1043 = vrot.lane.b32.xlu1 %v4352_v32, %s4067_s2 }
 0x185   : > { %1047 = vrot.lane.b32.xlu0 %v4356_v33, %s4067_s2 }
 0x187   : > { %1041 = vrot.lane.b32.xlu1 %v4360_v34, %s4067_s2 }
 0x189   : > { %1245 = vrot.lane.b32.xlu0 %v4340_v22, %s4068_s30 }
 0x18b   : > { %1243 = vrot.lane.b32.xlu1 %v4344_v27, %s4068_s30 }
 0x18d   : > { %1251 = vrot.lane.b32.xlu0 %v4348_v30, %s4068_s30 }
 0x18f   : > { %1249 = vrot.lane.b32.xlu1 %v4352_v32, %s4068_s30 }
 0x191   : > { %1253 = vrot.lane.b32.xlu0 %v4356_v33, %s4068_s30 }
 0x193   : > { %1247 = vrot.lane.b32.xlu1 %v4360_v34, %s4068_s30 }
 0x195   : > { %1366 = vrot.lane.b32.xlu0 %v4340_v22, %s4069_s18 }
 0x197   : > { %1364 = vrot.lane.b32.xlu1 %v4344_v27, %s4069_s18 }
 0x199   : > { %1372 = vrot.lane.b32.xlu0 %v4348_v30, %s4069_s18 }
 0x19b   : > { %1370 = vrot.lane.b32.xlu1 %v4352_v32, %s4069_s18 }
 0x19d   : > { %1374 = vrot.lane.b32.xlu0 %v4356_v33, %s4069_s18 }
 0x19f   : > { %1368 = vrot.lane.b32.xlu1 %v4360_v34, %s4069_s18 }
 0x1a1   : > { %1487 = vrot.lane.b32.xlu0 %v4340_v22, %s4070_s26 }
 0x1a3   : > { %1485 = vrot.lane.b32.xlu1 %v4344_v27, %s4070_s26 }
 0x1a5   : > { %1493 = vrot.lane.b32.xlu0 %v4348_v30, %s4070_s26 }
 0x1a7   : > { %1491 = vrot.lane.b32.xlu1 %v4352_v32, %s4070_s26 }
 0x1a9   : > { %1495 = vrot.lane.b32.xlu0 %v4356_v33, %s4070_s26 }
 0x1ab   : > { %1489 = vrot.lane.b32.xlu1 %v4360_v34, %s4070_s26 }
 0x1ad   : > { %1608 = vrot.lane.b32.xlu0 %v4340_v22, %s4071_s19 }
 0x1af   : > { %1606 = vrot.lane.b32.xlu1 %v4344_v27, %s4071_s19 }
 0x1b1   : > { %1614 = vrot.lane.b32.xlu0 %v4348_v30, %s4071_s19 }
 0x1b3   : > { %1612 = vrot.lane.b32.xlu1 %v4352_v32, %s4071_s19 }
 0x1b5   : > { %1616 = vrot.lane.b32.xlu0 %v4356_v33, %s4071_s19 }
 0x1b7   : > { %1610 = vrot.lane.b32.xlu1 %v4360_v34, %s4071_s19 }
 0x1b9   : > { %1742 = vperm.xlu0 %3843, %v1729_v35  }
 0x1bb   : > { %1737 = vperm.xlu1 %3844, %v1728_v36  }
 0x1cb   : > { %v731_v40 = vpop.permute.xlu0 %730 }
 0x1cd   : > { %v729_v44 = vpop.permute.xlu1 %728 }
 0x1cf   : > { %v737_v47 = vpop.permute.xlu0 %736 }
 0x1d0   : > { %v742_v48 = vsel %vm740_vm1, %v731_v40, %v737_v47  ;;  %v745_v49 = vsel %vm740_vm1, %v737_v47, %v731_v40  ;;  %v575_v40 = vld [vmem:[#allocation2 + $0x4] sm:$0x3] }
 0x1d1   : > { %v735_v50 = vpop.permute.xlu1 %734  ;;  %v760_v53 = vmul.f32 %v4464_v45, %v745_v49  ;;  %v761_v54 = vmul.f32 %v4467_v46, %v742_v48  ;;  %v4524_v48 = vrot.slane %v575_v40, %v4458_v41  ;;  %v4527_v49 = vrot.slane %v575_v40, %v4460_v42 }
 0x1d2   : > { %v741_v51 = vsel %vm740_vm1, %v729_v44, %v735_v50  ;;  %v744_v52 = vsel %vm740_vm1, %v735_v50, %v729_v44 }
 0x1d3   : > { %v758_v55 = vmul.f32 %v4464_v45, %v744_v52  ;;  %v759_v56 = vmul.f32 %v4467_v46, %v741_v51  ;;  %v739_v57 = vpop.permute.xlu0 %738 }
 0x1d5   : > { %v768_v58 = vpack.c.bf16 %v760_v53, %v758_v55  ;;  %v733_v59 = vpop.permute.xlu1 %732  ;;  %v769_v60 = vpack.c.bf16 %v761_v54, %v759_v56 }
 0x1d6   : > { %v743_v61 = vsel %vm740_vm1, %v733_v59, %v739_v57  ;;  %v746_v62 = vsel %vm740_vm1, %v739_v57, %v733_v59 }
 0x1d7   : > { %v762_v63 = vmul.f32 %v4464_v45, %v746_v62  ;;  %v763_v1 = vmul.f32 %v4467_v46, %v743_v61  ;;  %v686_v2 = vpop.permute.xlu0 %685  ;;  %794 = vmatprep.subr.bf16.mxu1 %v769_v60  ;;  %v3849_v62 = vld [vmem:[%s5315_s4] sm:$0xff]  }
 0x1d8   : > { %795 = vmatpush1.bf16.msra.mxu1 %v768_v58 }
 0x1d9   : > { %v770_v4 = vpack.c.bf16 %v762_v63, %v762_v63  ;;  %v771_v5 = vpack.c.bf16 %v763_v1, %v763_v1  ;;  %v684_v6 = vpop.permute.xlu1 %683 }
 0x1db   : > { %v692_v9 = vpop.permute.xlu0 %691  ;;  %3524 = vmatprep.subr.msk.bf16.mxu1 %vm787_vm3, %v771_v5  ;;  %v789_v10 = vsel %vm787_vm3, %v770_v4, 0 }
 0x1dc   : > { %v699_v12 = vsel %vm697_vm2, %v686_v2, %v692_v9  ;;  %v702_v13 = vsel %vm697_vm2, %v692_v9, %v686_v2  ;;  %797 = vmatpush1.bf16.msra.mxu1 %v789_v10  ;;  %v576_v10 = vld [vmem:[#allocation2 + $0x6] sm:$0x3] }
 0x1dd   : > { %v690_v14 = vpop.permute.xlu1 %689  ;;  %v717_v17 = vmul.f32 %v4489_v7, %v702_v13  ;;  %v718_v18 = vmul.f32 %v4492_v8, %v699_v12 }
 0x1de   : > { %v698_v15 = vsel %vm697_vm2, %v684_v6, %v690_v14  ;;  %v701_v16 = vsel %vm697_vm2, %v690_v14, %v684_v6  ;;  %v4558_v14 = vrot.slane %v576_v10, %v4460_v42 }
 0x1df   : > { %v715_v19 = vmul.f32 %v4489_v7, %v701_v16  ;;  %v716_v21 = vmul.f32 %v4492_v8, %v698_v15  ;;  %v694_v24 = vpop.permute.xlu0 %693  ;;  %3525 = vmatmul.mubr.msk.bf16.vlgmr.msra.gmra.mrb[4].mxu1 %vm780_vm4, %v3847_v11 }
 0x1e0   : > { %836 = vmatprep.mubr.bf16.mxu1 %v4063_v0 }
 0x1e1   : > { %v724_v25 = vpack.c.bf16 %v717_v17, %v715_v19  ;;  %v688_v26 = vpop.permute.xlu1 %687  ;;  %v725_v28 = vpack.c.bf16 %v718_v18, %v716_v21  ;;  %v3850_v17 = vld [vmem:[%s5315_s4 + $0x8] ss:$0 sps:$4 sm:$0xff]  }
 0x1e2   : > { %v700_v29 = vsel %vm697_vm2, %v688_v26, %v694_v24  ;;  %v703_v31 = vsel %vm697_vm2, %v694_v24, %v688_v26 }
 0x1e3   : > { %v719_v35 = vmul.f32 %v4489_v7, %v703_v31  ;;  %v720_v36 = vmul.f32 %v4492_v8, %v700_v29  ;;  %v919_v37 = vpop.permute.xlu0 %918  ;;  %865 = vmatprep.subr.bf16.mxu1 %v725_v28  ;;  %v4575_v28 = vrot.slane %v576_v10, %v4458_v41 }
 0x1e4   : > { %866 = vmatpush1.bf16.msra.mxu1 %v724_v25 }
 0x1e5   : > { %v726_v43 = vpack.c.bf16 %v719_v35, %v719_v35  ;;  %v727_v44 = vpack.c.bf16 %v720_v36, %v720_v36  ;;  %v917_v47 = vpop.permute.xlu1 %916 }
 0x1e7   : > { %v925_v50 = vpop.permute.xlu0 %924  ;;  %3526 = vmatmul.mubr.msk.bf16.gmra.mrb[8].mxu1 %vm780_vm4, %v3848_v38  ;;  %3529 = vmatprep.subr.msk.bf16.mxu1 %vm787_vm3, %v727_v44  ;;  %v860_v51 = vsel %vm787_vm3, %v726_v43, 0 }
 0x1e8   : > { %v930_v52 = vsel %vm928_vm5, %v919_v37, %v925_v50  ;;  %v933_v53 = vsel %vm928_vm5, %v925_v50, %v919_v37  ;;  %868 = vmatpush1.bf16.msra.mxu1 %v860_v51  ;;  %897 = vmatprep.mubr.bf16.mxu1 %v4063_v0 }
 0x1e9   : > { %v923_v54 = vpop.permute.xlu1 %922  ;;  %v948_v57 = vmul.f32 %v4524_v48, %v933_v53  ;;  %v949_v58 = vmul.f32 %v4527_v49, %v930_v52 }
 0x1ea   : > { %v929_v55 = vsel %vm928_vm5, %v917_v47, %v923_v54  ;;  %v932_v56 = vsel %vm928_vm5, %v923_v54, %v917_v47  ;;  %v3851_v47 = vld [vmem:[%s5315_s4 + $0x18] sm:$0xff]  }
 0x1eb   : > { %v946_v59 = vmul.f32 %v4524_v48, %v932_v56  ;;  %v947_v60 = vmul.f32 %v4527_v49, %v929_v55  ;;  %v927_v61 = vpop.permute.xlu0 %926 }
 0x1ed   : > { %v956_v63 = vpack.c.bf16 %v948_v57, %v946_v59  ;;  %v921_v1 = vpop.permute.xlu1 %920  ;;  %v957_v2 = vpack.c.bf16 %v949_v58, %v947_v60  ;;  %v1163_v58 = vpack.c.bf16 %v4348_v30, %v4352_v32  ;;  %v3852_v59 = vld [vmem:[%s5315_s4 + $0x20] ss:$0 sps:$4 sm:$0xff]   ;;  %v3853_v30 = vld [vmem:[%s5315_s4 + $0x24] sm:$0xff]  }
 0x1ee   : > { %v931_v3 = vsel %vm928_vm5, %v921_v1, %v927_v61  ;;  %v934_v4 = vsel %vm928_vm5, %v927_v61, %v921_v1 }
 0x1ef   : > { %v950_v5 = vmul.f32 %v4524_v48, %v934_v4  ;;  %v951_v6 = vmul.f32 %v4527_v49, %v931_v3  ;;  %v1040_v9 = vpop.permute.xlu0 %1039  ;;  %3530 = vmatmul.mubr.msk.bf16.vlgmr.msra.gmra.mrb[4].mxu1 %vm780_vm4, %v3849_v62  ;;  %980 = vmatprep.subr.bf16.mxu1 %v957_v2  ;;  %v577_v62 = vld [vmem:[#allocation2 + $0xa] sm:$0x3]  ;;  %v1162_v3 = vpack.c.bf16 %v4340_v22, %v4344_v27 }
 0x1f0   : > { %981 = vmatpush1.bf16.msra.mxu1 %v956_v63  ;;  %907 = vmatprep.mubr.bf16.mxu1 %v4063_v0  ;;  %v4609_v1 = vrot.slane %v577_v62, %v4460_v42 }
 0x1f1   : > { %v958_v11 = vpack.c.bf16 %v950_v5, %v950_v5  ;;  %v959_v12 = vpack.c.bf16 %v951_v6, %v951_v6  ;;  %v1038_v13 = vpop.permute.xlu1 %1037  ;;  %v1165_v6 = vpack.c.bf16 %v4356_v33, %v4356_v33 }
 0x1f3   : > { %v1046_v15 = vpop.permute.xlu0 %1045  ;;  %3537 = vmatprep.subr.msk.bf16.mxu1 %vm787_vm3, %v959_v12  ;;  %v975_v16 = vsel %vm787_vm3, %v958_v11, 0  ;;  %v3854_v12 = vld [vmem:[%s5315_s4 + $0x2c] ss:$0 sps:$4 sm:$0xff]  }
 0x1f4   : > { %v1051_v18 = vsel %vm1049_vm6, %v1040_v9, %v1046_v15  ;;  %983 = vmatpush1.bf16.msra.mxu1 %v975_v16  ;;  %v1054_v29 = vsel %vm1049_vm6, %v1046_v15, %v1040_v9  ;;  %v1164_v9 = vpack.c.bf16 %v4360_v34, %v4360_v34  ;;  %v4632_v15 = vrot.slane %v577_v62, %v4458_v41 }
 0x1f5   : > { %v1044_v19 = vpop.permute.xlu1 %1043  ;;  %v1070_v24 = vmul.f32 %v4558_v14, %v1051_v18  ;;  %v1069_v50 = vmul.f32 %v4575_v28, %v1054_v29  ;;  %v3855_v29 = vld [vmem:[%s5315_s4 + $0x30] sm:$0xff]  }
 0x1f6   : > { %v1050_v21 = vsel %vm1049_vm6, %v1038_v13, %v1044_v19  ;;  %v1053_v25 = vsel %vm1049_vm6, %v1044_v19, %v1038_v13  ;;  %v1181_v22 = vsel %vm787_vm3, %v1164_v9, 0 }
 0x1f7   : > { %v1068_v26 = vmul.f32 %v4558_v14, %v1050_v21  ;;  %3531 = vmatmul.mubr.msk.bf16.gmra.mrb[12].mxu1 %vm780_vm4, %v3850_v17  ;;  %v1048_v31 = vpop.permute.xlu0 %1047  ;;  %v1067_v37 = vmul.f32 %v4575_v28, %v1053_v25  ;;  %v578_v21 = vld [vmem:[#allocation2 + $0xc] sm:$0x3] }
 0x1f8   : > { %1012 = vmatprep.mubr.bf16.mxu1 %v4063_v0 }
 0x1f9   : > { %v1042_v35 = vpop.permute.xlu1 %1041  ;;  %v1078_v36 = vpack.c.bf16 %v1070_v24, %v1068_v26  ;;  %v1077_v53 = vpack.c.bf16 %v1069_v50, %v1067_v37 }
 0x1fa   : > { %v1052_v38 = vsel %vm1049_vm6, %v1042_v35, %v1048_v31  ;;  %v1055_v40 = vsel %vm1049_vm6, %v1048_v31, %v1042_v35 }
 0x1fb   : > { %v1071_v43 = vmul.f32 %v4575_v28, %v1055_v40  ;;  %v1072_v44 = vmul.f32 %v4558_v14, %v1052_v38  ;;  %1101 = vmatprep.subr.bf16.mxu1 %v1078_v36  ;;  %v1246_v55 = vpop.permute.xlu0 %1245  ;;  %v4652_v36 = vrot.slane %v578_v21, %v4460_v42 }
 0x1fd   : > { %v1080_v51 = vpack.c.bf16 %v1072_v44, %v1072_v44  ;;  %v1244_v52 = vpop.permute.xlu1 %1243  ;;  %v1079_v54 = vpack.c.bf16 %v1071_v43, %v1071_v43 }
 0x1ff   : > { %3538 = vmatmul.mubr.msk.bf16.vlgmr.msra.gmra.mrb[4].mxu1 %vm780_vm4, %v3851_v47  ;;  %v1096_v57 = vsel %vm787_vm3, %v1079_v54, 0  ;;  %v1252_v60 = vpop.permute.xlu0 %1251 }
 0x200   : > { %1102 = vmatpush1.bf16.msra.mxu1 %v1077_v53  ;;  %1022 = vmatprep.mubr.bf16.mxu1 %v4063_v0  ;;  %v1260_v2 = vsel %vm1255_vm7, %v1252_v60, %v1246_v55  ;;  %v1257_v18 = vsel %vm1255_vm7, %v1246_v55, %v1252_v60  ;;  %v3856_v55 = vld [vmem:[%s5315_s4 + $0x38] ss:$0 sps:$4 sm:$0xff]  }
 0x201   : > { %3545 = vmatprep.subr.msk.bf16.mxu1 %vm787_vm3, %v1080_v51  ;;  %v1250_v56 = vpop.permute.xlu1 %1249  ;;  %v1276_v10 = vmul.f32 %v4609_v1, %v1260_v2  ;;  %v1275_v31 = vmul.f32 %v4632_v15, %v1257_v18  ;;  %v3858_v18 = vld [vmem:[%s5315_s4 + $0x44] ss:$0 sps:$4 sm:$0xff]  }
 0x202   : > { %v1259_v32 = vsel %vm1255_vm7, %v1250_v56, %v1244_v52  ;;  %v1256_v34 = vsel %vm1255_vm7, %v1244_v52, %v1250_v56 }
 0x203   : > { %v1254_v63 = vpop.permute.xlu0 %1253  ;;  %v1274_v4 = vmul.f32 %v4609_v1, %v1259_v32  ;;  %v1273_v19 = vmul.f32 %v4632_v15, %v1256_v34 }
 0x204   : > { %1104 = vmatpush1.bf16.msra.mxu1 %v1096_v57 }
 0x205   : > { %1186 = vmatprep.subr.bf16.mxu1 %v1163_v58  ;;  %v1248_v61 = vpop.permute.xlu1 %1247  ;;  %v1284_v27 = vpack.c.bf16 %v1276_v10, %v1274_v4  ;;  %v1283_v38 = vpack.c.bf16 %v1275_v31, %v1273_v19  ;;  %v4669_v58 = vrot.slane %v578_v21, %v4458_v41 }
 0x206   : > { %v1258_v16 = vsel %vm1255_vm7, %v1248_v61, %v1254_v63  ;;  %v1261_v17 = vsel %vm1255_vm7, %v1254_v63, %v1248_v61 }
 0x207   : > { %3539 = vmatmul.mubr.msk.bf16.gmra.mrb[16].mxu1 %vm780_vm4, %v3852_v59  ;;  %v1367_v11 = vpop.permute.xlu0 %1366  ;;  %v1277_v24 = vmul.f32 %v4632_v15, %v1258_v16  ;;  %v1278_v25 = vmul.f32 %v4609_v1, %v1261_v17 }
 0x208   : > { %1133 = vmatprep.mubr.bf16.mxu1 %v4063_v0 }
 0x209   : > { %v1365_v5 = vpop.permute.xlu1 %1364  ;;  %v1285_v43 = vpack.c.bf16 %v1277_v24, %v1277_v24  ;;  %v1286_v44 = vpack.c.bf16 %v1278_v25, %v1278_v25 }
 0x20b   : > { %v1373_v13 = vpop.permute.xlu0 %1372  ;;  %v1302_v53 = vsel %vm787_vm3, %v1285_v43, 0 }
 0x20c   : > { %v1381_v40 = vsel %vm1376_vm8, %v1373_v13, %v1367_v11  ;;  %v1378_v61 = vsel %vm1376_vm8, %v1367_v11, %v1373_v13 }
 0x20d   : > { %v1371_v33 = vpop.permute.xlu1 %1370  ;;  %v1397_v50 = vmul.f32 %v4652_v36, %v1381_v40  ;;  %v1396_v4 = vmul.f32 %v4669_v58, %v1378_v61 }
 0x20e   : > { %v1380_v35 = vsel %vm1376_vm8, %v1371_v33, %v1365_v5  ;;  %v1377_v56 = vsel %vm1376_vm8, %v1365_v5, %v1371_v33 }
 0x20f   : > { %3546 = vmatmul.mubr.msk.bf16.vlgmr.msra.gmra.mrb[4].mxu1 %vm780_vm4, %v3853_v30  ;;  %v1375_v37 = vpop.permute.xlu0 %1374  ;;  %v1395_v47 = vmul.f32 %v4652_v36, %v1380_v35  ;;  %v1394_v63 = vmul.f32 %v4669_v58, %v1377_v56  ;;  %v579_v30 = vld [vmem:[#allocation2 + $0xe] sm:$0x3] }
 0x210   : > { %1187 = vmatpush1.bf16.msra.mxu1 %v1162_v3  ;;  %1143 = vmatprep.mubr.bf16.mxu1 %v4063_v0  ;;  %v3857_v3 = vld [vmem:[%s5315_s4 + $0x3c] sm:$0xff]   ;;  %v4706_v24 = vrot.slane %v579_v30, %v4458_v41 }
 0x211   : > { %3553 = vmatprep.subr.msk.bf16.mxu1 %vm787_vm3, %v1165_v6  ;;  %v1369_v26 = vpop.permute.xlu1 %1368  ;;  %v1405_v54 = vpack.c.bf16 %v1397_v50, %v1395_v47  ;;  %v4689_v6 = vrot.slane %v579_v30, %v4460_v42  ;;  %v1404_v10 = vpack.c.bf16 %v1396_v4, %v1394_v63 }
 0x212   : > { %v1379_v59 = vsel %vm1376_vm8, %v1369_v26, %v1375_v37  ;;  %v1382_v60 = vsel %vm1376_vm8, %v1375_v37, %v1369_v26  ;;  %v580_v37 = vld [vmem:[#allocation2 + $0x10] sm:$0x3] }
 0x213   : > { %v1488_v52 = vpop.permute.xlu0 %1487  ;;  %v1398_v32 = vmul.f32 %v4669_v58, %v1379_v59  ;;  %v1399_v2 = vmul.f32 %v4652_v36, %v1382_v60  ;;  %v3860_v60 = vld [vmem:[%s5315_s4 + $0x50] ss:$0 sps:$4 sm:$0xff]   ;;  %v4743_v30 = vrot.slane %v580_v37, %v4458_v41  ;;  %v3861_v41 = vld [vmem:[%s5315_s4 + $0x54] sm:$0xff]  }
 0x214   : > { %1189 = vmatpush1.bf16.msra.mxu1 %v1181_v22 }
 0x215   : > { %1307 = vmatprep.subr.bf16.mxu1 %v1284_v27  ;;  %v1486_v51 = vpop.permute.xlu1 %1485  ;;  %v1406_v22 = vpack.c.bf16 %v1398_v32, %v1398_v32  ;;  %v1407_v27 = vpack.c.bf16 %v1399_v2, %v1399_v2 }
 0x217   : > { %3547 = vmatmul.mubr.msk.bf16.gmra.mrb[20].mxu1 %vm780_vm4, %v3854_v12  ;;  %v1494_v62 = vpop.permute.xlu0 %1493  ;;  %v1423_v16 = vsel %vm787_vm3, %v1406_v22, 0 }
 0x218   : > { %1218 = vmatprep.mubr.bf16.mxu1 %v4063_v0  ;;  %v1502_v11 = vsel %vm1497_vm9, %v1494_v62, %v1488_v52 }
 0x219   : > { %v1492_v57 = vpop.permute.xlu1 %1491  ;;  %v1518_v34 = vmul.f32 %v4689_v6, %v1502_v11 }
 0x21a   : > { %v1501_v5 = vsel %vm1497_vm9, %v1492_v57, %v1486_v51  ;;  %v1498_v21 = vsel %vm1497_vm9, %v1486_v51, %v1492_v57  ;;  %v4726_v51 = vrot.slane %v580_v37, %v4460_v42 }
 0x21b   : > { %v1516_v12 = vmul.f32 %v4689_v6, %v1501_v5  ;;  %v1496_v33 = vpop.permute.xlu0 %1495  ;;  %v1515_v35 = vmul.f32 %v4706_v24, %v1498_v21 }
 0x21d   : > { %v1490_v9 = vpop.permute.xlu1 %1489  ;;  %v1526_v17 = vpack.c.bf16 %v1518_v34, %v1516_v12  ;;  %v3863_v34 = vld [vmem:[%s5315_s4 + $0x60] sm:$0xff]  }
 0x21e   : > { %v1500_v25 = vsel %vm1497_vm9, %v1490_v9, %v1496_v33  ;;  %v1503_v26 = vsel %vm1497_vm9, %v1496_v33, %v1490_v9  ;;  %v3862_v33 = vld [vmem:[%s5315_s4 + $0x5c] ss:$0 sps:$4 sm:$0xff]  }
 0x21f   : > { %3554 = vmatmul.mubr.msk.bf16.vlgmr.msra.gmra.mrb[4].mxu1 %vm780_vm4, %v3855_v29  ;;  %v1609_v19 = vpop.permute.xlu0 %1608  ;;  %v1499_v29 = vsel %vm1497_vm9, %v1488_v52, %v1494_v62  ;;  %v1520_v40 = vmul.f32 %v4689_v6, %v1503_v26 }
 0x220   : > { %1308 = vmatpush1.bf16.msra.mxu1 %v1283_v38  ;;  %1228 = vmatprep.mubr.bf16.mxu1 %v4063_v0  ;;  %v1519_v38 = vmul.f32 %v4706_v24, %v1500_v25  ;;  %v1517_v47 = vmul.f32 %v4706_v24, %v1499_v29 }
 0x221   : > { %3561 = vmatprep.subr.msk.bf16.mxu1 %vm787_vm3, %v1286_v44  ;;  %v1607_v13 = vpop.permute.xlu1 %1606  ;;  %v3859_v44 = vld [vmem:[%s5315_s4 + $0x48] sm:$0xff]  }
 0x222   : > { %v1525_v52 = vpack.c.bf16 %v1517_v47, %v1515_v35 }
 0x223   : > { %v1615_v43 = vpop.permute.xlu0 %1614 }
 0x224   : > { %1310 = vmatpush1.bf16.msra.mxu1 %v1302_v53  ;;  %v1623_v53 = vsel %vm1618_vm10, %v1615_v43, %v1609_v19 }
 0x225   : > { %1428 = vmatprep.subr.bf16.mxu1 %v1405_v54  ;;  %v1613_v31 = vpop.permute.xlu1 %1612  ;;  %v1527_v54 = vpack.c.bf16 %v1519_v38, %v1519_v38  ;;  %v1639_v57 = vmul.f32 %v4726_v51, %v1623_v53 }
 0x226   : > { %v1622_v50 = vsel %vm1618_vm10, %v1613_v31, %v1607_v13  ;;  %v1619_v62 = vsel %vm1618_vm10, %v1607_v13, %v1613_v31  ;;  %v3864_v13 = vld [vmem:[%s5315_s4 + $0x68] ss:$0 sps:$4 sm:$0xff]  }
 0x227   : > { %3555 = vmatmul.mubr.msk.bf16.gmra.mrb[24].mxu1 %vm780_vm4, %v3856_v55  ;;  %v1528_v55 = vpack.c.bf16 %v1520_v40, %v1520_v40  ;;  %v1637_v56 = vmul.f32 %v4726_v51, %v1622_v50  ;;  %v1544_v42 = vsel %vm787_vm3, %v1527_v54, 0  ;;  %v1617_v63 = vpop.permute.xlu0 %1616  ;;  %v1636_v4 = vmul.f32 %v4743_v30, %v1619_v62 }
 0x228   : > { %1339 = vmatprep.mubr.bf16.mxu1 %v4063_v0 }
 0x229   : > { %v1647_v59 = vpack.c.bf16 %v1639_v57, %v1637_v56  ;;  %v1611_v61 = vpop.permute.xlu1 %1610 }
 0x22a   : > { %v1621_v32 = vsel %vm1618_vm10, %v1611_v61, %v1617_v63  ;;  %v1624_v2 = vsel %vm1618_vm10, %v1617_v63, %v1611_v61 }
 0x22b   : > { %v1640_v5 = vmul.f32 %v4743_v30, %v1621_v32  ;;  %v1641_v9 = vmul.f32 %v4726_v51, %v1624_v2 }
 0x22d   : > { %v1648_v22 = vpack.c.bf16 %v1640_v5, %v1640_v5 }
 0x22f   : > { %3562 = vmatmul.mubr.msk.bf16.vlgmr.msra.gmra.mrb[4].mxu1 %vm780_vm4, %v3857_v3  ;;  %v1620_v3 = vsel %vm1618_vm10, %v1609_v19, %v1615_v43  ;;  %v1665_v12 = vsel %vm787_vm3, %v1648_v22, 0 }
 0x230   : > { %1429 = vmatpush1.bf16.msra.mxu1 %v1404_v10  ;;  %1349 = vmatprep.mubr.bf16.mxu1 %v4063_v0  ;;  %v1638_v10 = vmul.f32 %v4743_v30, %v1620_v3 }
 0x231   : > { %3569 = vmatprep.subr.msk.bf16.mxu1 %vm787_vm3, %v1407_v27  ;;  %v1649_v27 = vpack.c.bf16 %v1641_v9, %v1641_v9 }
 0x232   : > { %v1646_v11 = vpack.c.bf16 %v1638_v10, %v1636_v4 }
 0x234   : > { %1431 = vmatpush1.bf16.msra.mxu1 %v1423_v16 }
 0x235   : > { %1549 = vmatprep.subr.bf16.mxu1 %v1526_v17 }
 0x237   : > { %3563 = vmatmul.mubr.msk.bf16.gmra.mrb[28].mxu1 %vm780_vm4, %v3858_v18 }
 0x238   : > { %1460 = vmatprep.mubr.bf16.mxu1 %v4063_v0 }
 0x23f   : > { %3570 = vmatmul.mubr.msk.bf16.vlgmr.msra.gmra.mrb[4].mxu1 %vm780_vm4, %v3859_v44 }
 0x240   : > { %1550 = vmatpush1.bf16.msra.mxu1 %v1525_v52  ;;  %1470 = vmatprep.mubr.bf16.mxu1 %v4063_v0 }
 0x241   : > { %3577 = vmatprep.subr.msk.bf16.mxu1 %vm787_vm3, %v1528_v55 }
 0x244   : > { %1552 = vmatpush1.bf16.msra.mxu1 %v1544_v42 }
 0x245   : > { %1670 = vmatprep.subr.bf16.mxu1 %v1647_v59 }
 0x247   : > { %3571 = vmatmul.mubr.msk.bf16.gmra.mrb[32].mxu1 %vm780_vm4, %v3860_v60 }
 0x248   : > { %1581 = vmatprep.mubr.bf16.mxu1 %v4063_v0 }
 0x24f   : > { %3578 = vmatmul.mubr.msk.bf16.vlgmr.msra.gmra.mrb[4].mxu1 %vm780_vm4, %v3861_v41 }
 0x250   : > { %1671 = vmatpush1.bf16.msra.mxu1 %v1646_v11  ;;  %1591 = vmatprep.mubr.bf16.mxu1 %v4063_v0 }
 0x251   : > { %3585 = vmatprep.subr.msk.bf16.mxu1 %vm787_vm3, %v1649_v27 }
 0x254   : > { %1673 = vmatpush1.bf16.msra.mxu1 %v1665_v12 }
 0x257   : > { %3579 = vmatmul.mubr.msk.bf16.gmra.mrb[36].mxu1 %vm780_vm4, %v3862_v33 }
 0x258   : > { %1702 = vmatprep.mubr.bf16.mxu1 %v4063_v0 }
 0x25f   : > { %3586 = vmatmul.mubr.msk.bf16.vlgmr.msra.gmra.mrb[4].mxu1 %vm780_vm4, %v3863_v34 }
 0x260   : > { %1712 = vmatprep.mubr.bf16.mxu1 %v4063_v0 }
 0x267   : > { %3587 = vmatmul.mubr.msk.bf16.gmra.mrb[40].mxu1 %vm780_vm4, %v3864_v13 }
 0x268   : > { %3000 = vmatprep.mubr.bf16.mxu1 %v4063_v0 }
 0x2ba   : > { %v838_v16 = vpop.f32.mrb[8].mxu1 }
 0x2bb   : > { %v840_v17 = vpop.f32.mrb[9].mxu1 }
 0x2bc   : > { %v842_v18 = vpop.f32.mrb[10].mxu1 }
 0x2bd   : > { %v843_v19 = vpop.f32.mrb[11].mxu1 }
 0x2ca   : > { %v909_v21 = vpop.f32.mrb[12].mxu1 }
 0x2cb   : > { %v910_v25 = vadd.f32 %v909_v21, %v838_v16  ;;  %v911_v26 = vpop.f32.mrb[13].mxu1  ;;  %v1738_v21 = vpop.permute.xlu1 %1737 }
 0x2cc   : > { %v912_v29 = vadd.f32 %v911_v26, %v840_v17  ;;  %v913_v31 = vpop.f32.mrb[14].mxu1 }
 0x2cd   : > { %v914_v35 = vpop.f32.mrb[15].mxu1 }
 0x2da   : > { %v1024_v37 = vpop.f32.mrb[16].mxu1 }
 0x2db   : > { %v1035_v38 = vadd.f32 %v1024_v37, %v910_v25  ;;  %v1026_v40 = vpop.f32.mrb[17].mxu1 }
 0x2dc   : > { %v1036_v43 = vadd.f32 %v1026_v40, %v912_v29  ;;  %v1028_v44 = vpop.f32.mrb[18].mxu1 }
 0x2dd   : > { %v1029_v47 = vpop.f32.mrb[19].mxu1 }
 0x2de   : > { %v1743_v47 = vpop.permute.xlu0 %1742 }
 0x2ea   : > { %v1145_v50 = vpop.f32.mrb[20].mxu1 }
 0x2eb   : > { %v1156_v52 = vadd.f32 %v1145_v50, %v1035_v38  ;;  %v1147_v53 = vpop.f32.mrb[21].mxu1 }
 0x2ec   : > { %v1157_v54 = vadd.f32 %v1147_v53, %v1036_v43  ;;  %v1149_v55 = vpop.f32.mrb[22].mxu1 }
 0x2ed   : > { %v1150_v56 = vpop.f32.mrb[23].mxu1 }
 0x2fa   : > { %v1230_v57 = vpop.f32.mrb[24].mxu1 }
 0x2fb   : > { %v1241_v42 = vadd.f32 %v1230_v57, %v1156_v52  ;;  %v1232_v59 = vpop.f32.mrb[25].mxu1 }
 0x2fc   : > { %v1242_v60 = vadd.f32 %v1232_v59, %v1157_v54  ;;  %v1234_v61 = vpop.f32.mrb[26].mxu1 }
 0x2fd   : > { %v1235_v62 = vpop.f32.mrb[27].mxu1 }
 0x30a   : > { %v1351_v63 = vpop.f32.mrb[28].mxu1 }
 0x30b   : > { %v1362_v32 = vadd.f32 %v1351_v63, %v1241_v42  ;;  %v1353_v2 = vpop.f32.mrb[29].mxu1  ;;  %v2424_v63 = vld [vmem:[%s5318_s7 + $0x8] sm:$0xff] }
 0x30c   : > { %v1363_v3 = vadd.f32 %v1353_v2, %v1242_v60  ;;  %v1355_v4 = vpop.f32.mrb[30].mxu1 }
 0x30d   : > { %v1356_v5 = vpop.f32.mrb[31].mxu1 }
 0x31a   : > { %v1472_v9 = vpop.f32.mrb[32].mxu1 }
 0x31b   : > { %v1483_v41 = vadd.f32 %v1472_v9, %v1362_v32  ;;  %v1474_v10 = vpop.f32.mrb[33].mxu1 }
 0x31c   : > { %v1484_v11 = vadd.f32 %v1474_v10, %v1363_v3  ;;  %v1476_v22 = vpop.f32.mrb[34].mxu1 }
 0x31d   : > { %v1477_v27 = vpop.f32.mrb[35].mxu1 }
 0x32a   : > { %v1593_v12 = vpop.f32.mrb[36].mxu1 }
 0x32b   : > { %v1604_v33 = vadd.f32 %v1593_v12, %v1483_v41  ;;  %v1595_v34 = vpop.f32.mrb[37].mxu1 }
 0x32c   : > { %v1605_v13 = vadd.f32 %v1595_v34, %v1484_v11  ;;  %v1597_v16 = vpop.f32.mrb[38].mxu1 }
 0x32d   : > { %v1598_v17 = vpop.f32.mrb[39].mxu1 }
 0x332   : > { %v4778_v18 = vpop.f32.mrb[4].mxu1 }
 0x333   : > { %v4780_v19 = vpop.f32.mrb[5].mxu1 }
 0x334   : > { %v1708_v25 = vpop.f32.mrb[6].mxu1 }
 0x335   : > { %v1747_v26 = vadd.f32 %v1738_v21, %v1708_v25  ;;  %v1710_v29 = vpop.f32.mrb[7].mxu1  ;;  %v3865_v25 = vld [vmem:[#allocation7 + $0x8] sm:$0xff]  }
 0x336   : > { %v1748_v31 = vadd.f32 %v1738_v21, %v1710_v29 }
 0x337   : > { %v1753_v35 = vmul.f32 0.05, %v1747_v26 }
 0x338   : > { %v1754_v38 = vmul.f32 0.05, %v1748_v31 }
 0x339   : > { %v4782_v37 = vmax.f32 %v1747_v26, %v1753_v35 }
 0x33a   : > { %v1714_v40 = vpop.f32.mrb[40].mxu1  ;;  %v4786_v53 = vmax.f32 %v1748_v31, %v1754_v38 }
 0x33b   : > { %v1725_v43 = vadd.f32 %v1714_v40, %v1604_v33  ;;  %1783 = vrot.lane.b32.xlu1 %v4782_v37, %s4064_s29  ;;  %v1716_v44 = vpop.f32.mrb[41].mxu1 }
 0x33c   : > { %v1726_v50 = vadd.f32 %v1716_v44, %v1605_v13  ;;  %v1718_v52 = vpop.f32.mrb[42].mxu1 }
 0x33d   : > { %v1749_v54 = vadd.f32 %v1743_v47, %v1725_v43  ;;  %v1719_v55 = vpop.f32.mrb[43].mxu1 }
 0x33e   : > { %v1750_v56 = vadd.f32 %v1743_v47, %v1726_v50 }
 0x33f   : > { %v1755_v57 = vmul.f32 0.05, %v1749_v54  ;;  %1787 = vrot.lane.b32.xlu1 %v4786_v53, %s4064_s29 }
 0x340   : > { %v1756_v42 = vmul.f32 0.05, %v1750_v56 }
 0x341   : > { %v4790_v59 = vmax.f32 %v1749_v54, %v1755_v57 }
 0x342   : > { %v4792_v60 = vmax.f32 %v1750_v56, %v1756_v42 }
 0x343   : > { %1763 = vrot.lane.b32.xlu1 %v4782_v37, %s4065_s21  ;;  %1785 = vrot.lane.b32.xlu0 %v4790_v59, %s4064_s29  ;;  %v2062_v61 = vpack.c.bf16 %v4790_v59, %v4782_v37 }
 0x344   : > { %v2063_v62 = vpack.c.bf16 %v4792_v60, %v4786_v53 }
 0x347   : > { %1767 = vrot.lane.b32.xlu1 %v4786_v53, %s4065_s21  ;;  %1789 = vrot.lane.b32.xlu0 %v4792_v60, %s4064_s29 }
 0x34b   : > { %1907 = vrot.lane.b32.xlu1 %v4782_v37, %s4066_s0  ;;  %1765 = vrot.lane.b32.xlu0 %v4790_v59, %s4065_s21 }
 0x34f   : > { %1911 = vrot.lane.b32.xlu1 %v4786_v53, %s4066_s0  ;;  %1769 = vrot.lane.b32.xlu0 %v4792_v60, %s4065_s21 }
 0x353   : > { %1983 = vrot.lane.b32.xlu1 %v4782_v37, %s4067_s2  ;;  %1909 = vrot.lane.b32.xlu0 %v4790_v59, %s4066_s0 }
 0x357   : > { %1987 = vrot.lane.b32.xlu1 %v4786_v53, %s4067_s2  ;;  %1913 = vrot.lane.b32.xlu0 %v4792_v60, %s4066_s0 }
 0x35b   : > { %2119 = vrot.lane.b32.xlu1 %v4782_v37, %s4068_s30  ;;  %1985 = vrot.lane.b32.xlu0 %v4790_v59, %s4067_s2 }
 0x35f   : > { %2123 = vrot.lane.b32.xlu1 %v4786_v53, %s4068_s30  ;;  %1989 = vrot.lane.b32.xlu0 %v4792_v60, %s4067_s2 }
 0x363   : > { %2195 = vrot.lane.b32.xlu1 %v4782_v37, %s4069_s18  ;;  %2121 = vrot.lane.b32.xlu0 %v4790_v59, %s4068_s30 }
 0x367   : > { %2199 = vrot.lane.b32.xlu1 %v4786_v53, %s4069_s18  ;;  %2125 = vrot.lane.b32.xlu0 %v4792_v60, %s4068_s30 }
 0x36b   : > { %2271 = vrot.lane.b32.xlu1 %v4782_v37, %s4070_s26  ;;  %2197 = vrot.lane.b32.xlu0 %v4790_v59, %s4069_s18 }
 0x36f   : > { %2275 = vrot.lane.b32.xlu1 %v4786_v53, %s4070_s26  ;;  %2201 = vrot.lane.b32.xlu0 %v4792_v60, %s4069_s18 }
 0x373   : > { %2347 = vrot.lane.b32.xlu1 %v4782_v37, %s4071_s19  ;;  %2273 = vrot.lane.b32.xlu0 %v4790_v59, %s4070_s26 }
 0x377   : > { %2351 = vrot.lane.b32.xlu1 %v4786_v53, %s4071_s19  ;;  %2277 = vrot.lane.b32.xlu0 %v4792_v60, %s4070_s26 }
 0x37b   : > { %2432 = vperm.xlu1 %3844, %v2424_v63   ;;  %2349 = vrot.lane.b32.xlu0 %v4790_v59, %s4071_s19 }
 0x37f   : > { %2353 = vrot.lane.b32.xlu0 %v4792_v60, %s4071_s19 }
 0x3ad   : > { %v1784_v32 = vpop.permute.xlu1 %1783 }
 0x3b1   : > { %v1788_v2 = vpop.permute.xlu1 %1787 }
 0x3b2   : > { %v1791_v5 = vsel %vm740_vm1, %v1784_v32, %v1788_v2  ;;  %v1793_v9 = vsel %vm740_vm1, %v1788_v2, %v1784_v32 }
 0x3b3   : > { %v1795_v27 = vmul.f32 %v1793_v9, %v4464_v45  ;;  %v1796_v12 = vmul.f32 %v1791_v5, %v4467_v46 }
 0x3b5   : > { %v1764_v3 = vpop.permute.xlu1 %1763  ;;  %v1786_v4 = vpop.permute.xlu0 %1785 }
 0x3b9   : > { %v1768_v41 = vpop.permute.xlu1 %1767  ;;  %v1790_v10 = vpop.permute.xlu0 %1789 }
 0x3ba   : > { %v1792_v11 = vsel %vm740_vm1, %v1786_v4, %v1790_v10  ;;  %v1794_v22 = vsel %vm740_vm1, %v1790_v10, %v1786_v4  ;;  %v1771_v26 = vsel %vm697_vm2, %v1764_v3, %v1768_v41  ;;  %v1773_v29 = vsel %vm697_vm2, %v1768_v41, %v1764_v3  ;;  %v3866_v41 = vld [vmem:[#allocation7] sm:$0xff]  }
 0x3bb   : > { %v1797_v33 = vmul.f32 %v1794_v22, %v4464_v45  ;;  %v1798_v34 = vmul.f32 %v1792_v11, %v4467_v46  ;;  %v1775_v43 = vmul.f32 %v1773_v29, %v4489_v7  ;;  %v1776_v44 = vmul.f32 %v1771_v26, %v4492_v8 }
 0x3bd   : > { %v1802_v13 = vpack.c.bf16 %v1797_v33, %v1795_v27  ;;  %v1908_v16 = vpop.permute.xlu1 %1907  ;;  %v1766_v17 = vpop.permute.xlu0 %1765  ;;  %v1803_v21 = vpack.c.bf16 %v1798_v34, %v1796_v12 }
 0x3bf   : > { %1813 = vmatprep.subr.bf16.mxu0 %v1803_v21 }
 0x3c0   : > { %1814 = vmatpush1.bf16.msra.mxu0 %v1802_v13 }
 0x3c1   : > { %v1912_v31 = vpop.permute.xlu1 %1911  ;;  %v1770_v35 = vpop.permute.xlu0 %1769 }
 0x3c2   : > { %v1772_v38 = vsel %vm697_vm2, %v1766_v17, %v1770_v35  ;;  %v1774_v40 = vsel %vm697_vm2, %v1770_v35, %v1766_v17  ;;  %v1915_v57 = vsel %vm928_vm5, %v1908_v16, %v1912_v31  ;;  %v1917_v42 = vsel %vm928_vm5, %v1912_v31, %v1908_v16  ;;  %v3867_v31 = vld [vmem:[#allocation7 + $0x10] sm:$0xff]  }
 0x3c3   : > { %v1777_v47 = vmul.f32 %v1774_v40, %v4489_v7  ;;  %v1778_v50 = vmul.f32 %v1772_v38, %v4492_v8  ;;  %3589 = vmatmul.mubr.msk.bf16.vlgmr.msra.gmra.mrb[4].mxu0 %vm1809_vm11, %v3865_v25  ;;  %v1919_v3 = vmul.f32 %v1917_v42, %v4524_v48  ;;  %v1920_v4 = vmul.f32 %v1915_v57, %v4527_v49 }
 0x3c4   : > { %1896 = vmatprep.mubr.bf16.mxu0 %v4063_v0 }
 0x3c5   : > { %v1781_v52 = vpack.c.bf16 %v1777_v47, %v1775_v43  ;;  %v1910_v54 = vpop.permute.xlu0 %1909  ;;  %v1782_v55 = vpack.c.bf16 %v1778_v50, %v1776_v44  ;;  %v1984_v56 = vpop.permute.xlu1 %1983 }
 0x3c7   : > { %1864 = vmatprep.subr.bf16.mxu0 %v1782_v55  ;;  %v3868_v55 = vld [vmem:[#allocation7 + $0x18] sm:$0xff]  }
 0x3c8   : > { %1865 = vmatpush1.bf16.msra.mxu0 %v1781_v52 }
 0x3c9   : > { %v1914_v63 = vpop.permute.xlu0 %1913  ;;  %v1988_v10 = vpop.permute.xlu1 %1987 }
 0x3ca   : > { %v1916_v32 = vsel %vm928_vm5, %v1910_v54, %v1914_v63  ;;  %v1918_v2 = vsel %vm928_vm5, %v1914_v63, %v1910_v54  ;;  %v1991_v12 = vsel %vm1049_vm6, %v1984_v56, %v1988_v10  ;;  %v1993_v21 = vsel %vm1049_vm6, %v1988_v10, %v1984_v56 }
 0x3cb   : > { %v1921_v5 = vmul.f32 %v1918_v2, %v4524_v48  ;;  %v1922_v9 = vmul.f32 %v1916_v32, %v4527_v49  ;;  %v1996_v13 = vmul.f32 %v1991_v12, %v4558_v14  ;;  %v1995_v35 = vmul.f32 %v1993_v21, %v4575_v28  ;;  %v3870_v21 = vld [vmem:[#allocation7 + $0x28] sm:$0xff]  }
 0x3cd   : > { %v1926_v11 = vpack.c.bf16 %v1921_v5, %v1919_v3  ;;  %v1986_v22 = vpop.permute.xlu0 %1985  ;;  %v1927_v27 = vpack.c.bf16 %v1922_v9, %v1920_v4  ;;  %v2120_v38 = vpop.permute.xlu1 %2119  ;;  %v3869_v3 = vld [vmem:[#allocation7 + $0x20] sm:$0xff]  }
 0x3cf   : > { %3591 = vmatmul.mubr.msk.bf16.vlgmr.msra.gmra.mrb[4].mxu0 %vm1809_vm11, %v3866_v41  ;;  %1936 = vmatprep.subr.bf16.mxu0 %v1927_v27 }
 0x3d0   : > { %1937 = vmatpush1.bf16.msra.mxu0 %v1926_v11  ;;  %1968 = vmatprep.mubr.bf16.mxu0 %v4063_v0 }
 0x3d1   : > { %v1990_v33 = vpop.permute.xlu0 %1989  ;;  %v2124_v44 = vpop.permute.xlu1 %2123 }
 0x3d2   : > { %v1992_v34 = vsel %vm1049_vm6, %v1986_v22, %v1990_v33  ;;  %v1994_v16 = vsel %vm1049_vm6, %v1990_v33, %v1986_v22  ;;  %v2129_v50 = vsel %vm1255_vm7, %v2124_v44, %v2120_v38  ;;  %v2127_v32 = vsel %vm1255_vm7, %v2120_v38, %v2124_v44 }
 0x3d3   : > { %v1998_v17 = vmul.f32 %v1992_v34, %v4558_v14  ;;  %v1997_v26 = vmul.f32 %v1994_v16, %v4575_v28  ;;  %v2132_v56 = vmul.f32 %v2129_v50, %v4609_v1  ;;  %v2131_v4 = vmul.f32 %v2127_v32, %v4632_v15  ;;  %v3872_v32 = vld [vmem:[#allocation7 + $0x38] sm:$0xff]  }
 0x3d5   : > { %v2003_v25 = vpack.c.bf16 %v1998_v17, %v1996_v13  ;;  %v2122_v29 = vpop.permute.xlu0 %2121  ;;  %v2002_v40 = vpack.c.bf16 %v1997_v26, %v1995_v35  ;;  %v2196_v57 = vpop.permute.xlu1 %2195 }
 0x3d7   : > { %2012 = vmatprep.subr.bf16.mxu0 %v2003_v25 }
 0x3d9   : > { %v2126_v43 = vpop.permute.xlu0 %2125  ;;  %v2200_v60 = vpop.permute.xlu1 %2199 }
 0x3da   : > { %v2130_v47 = vsel %vm1255_vm7, %v2126_v43, %v2122_v29  ;;  %v2205_v2 = vsel %vm1376_vm8, %v2200_v60, %v2196_v57  ;;  %v2203_v33 = vsel %vm1376_vm8, %v2196_v57, %v2200_v60 }
 0x3db   : > { %3593 = vmatmul.mubr.msk.bf16.vlgmr.msra.gmra.mrb[4].mxu0 %vm1809_vm11, %v3867_v31  ;;  %v2134_v52 = vmul.f32 %v2130_v47, %v4609_v1  ;;  %v2208_v5 = vmul.f32 %v2205_v2, %v4652_v36  ;;  %v2207_v25 = vmul.f32 %v2203_v33, %v4669_v58  ;;  %v1727_v33 = vld [vmem:[%s5316_s5] sm:$0xff] }
 0x3dc   : > { %2013 = vmatpush1.bf16.msra.mxu0 %v2002_v40  ;;  %2044 = vmatprep.mubr.bf16.mxu0 %v4063_v0 }
 0x3dd   : > { %2072 = vmatprep.subr.bf16.mxu0 %v2063_v62  ;;  %v2198_v54 = vpop.permute.xlu0 %2197  ;;  %v2139_v42 = vpack.c.bf16 %v2134_v52, %v2132_v56  ;;  %v2128_v62 = vsel %vm1255_vm7, %v2122_v29, %v2126_v43  ;;  %v2272_v9 = vpop.permute.xlu1 %2271 }
 0x3de   : > { %v2133_v37 = vmul.f32 %v2128_v62, %v4632_v15 }
 0x3e0   : > { %v2138_v41 = vpack.c.bf16 %v2133_v37, %v2131_v4 }
 0x3e1   : > { %v2202_v53 = vpop.permute.xlu0 %2201  ;;  %v2276_v22 = vpop.permute.xlu1 %2275 }
 0x3e2   : > { %v2206_v63 = vsel %vm1376_vm8, %v2202_v53, %v2198_v54  ;;  %v2204_v27 = vsel %vm1376_vm8, %v2198_v54, %v2202_v53  ;;  %v2281_v34 = vsel %vm1497_vm9, %v2276_v22, %v2272_v9  ;;  %v2279_v47 = vsel %vm1497_vm9, %v2272_v9, %v2276_v22 }
 0x3e3   : > { %v2210_v59 = vmul.f32 %v2206_v63, %v4652_v36  ;;  %v2209_v13 = vmul.f32 %v2204_v27, %v4669_v58  ;;  %v2284_v26 = vmul.f32 %v2281_v34, %v4689_v6  ;;  %v2283_v56 = vmul.f32 %v2279_v47, %v4706_v24  ;;  %v589_v34 = vld [vmem:[%s5314_s3] sm:$0xff] }
 0x3e5   : > { %v2215_v10 = vpack.c.bf16 %v2210_v59, %v2208_v5  ;;  %v2348_v29 = vpop.permute.xlu1 %2347  ;;  %v2214_v31 = vpack.c.bf16 %v2209_v13, %v2207_v25  ;;  %v3873_v59 = vld [vmem:[#allocation7 + $0x40] sm:$0xff]  }
 0x3e6   : > { %v2423_v13 = vld [vmem:[%s5318_s7] sm:$0xff] }
 0x3e7   : > { %3595 = vmatmul.mubr.msk.bf16.vlgmr.msra.gmra.mrb[4].mxu0 %vm1809_vm11, %v3868_v55  ;;  %v3871_v55 = vld [vmem:[#allocation7 + $0x30] sm:$0xff]  }
 0x3e8   : > { %2073 = vmatpush1.bf16.msra.mxu0 %v2062_v61  ;;  %2104 = vmatprep.mubr.bf16.mxu0 %v4063_v0  ;;  %v2274_v61 = vpop.permute.xlu0 %2273 }
 0x3e9   : > { %2148 = vmatprep.subr.bf16.mxu0 %v2139_v42  ;;  %v2352_v40 = vpop.permute.xlu1 %2351 }
 0x3ea   : > { %v2357_v50 = vsel %vm1618_vm10, %v2352_v40, %v2348_v29  ;;  %v2355_v62 = vsel %vm1618_vm10, %v2348_v29, %v2352_v40 }
 0x3eb   : > { %v2360_v57 = vmul.f32 %v2357_v50, %v4726_v51  ;;  %v2359_v2 = vmul.f32 %v2355_v62, %v4743_v30 }
 0x3ec   : > { %v2278_v11 = vpop.permute.xlu0 %2277 }
 0x3ed   : > { %v2282_v12 = vsel %vm1497_vm9, %v2278_v11, %v2274_v61  ;;  %v2280_v43 = vsel %vm1497_vm9, %v2274_v61, %v2278_v11 }
 0x3ee   : > { %v2286_v16 = vmul.f32 %v2282_v12, %v4689_v6  ;;  %v2285_v52 = vmul.f32 %v2280_v43, %v4706_v24 }
 0x3f0   : > { %v2350_v17 = vpop.permute.xlu0 %2349  ;;  %v2291_v35 = vpack.c.bf16 %v2286_v16, %v2284_v26  ;;  %v2290_v42 = vpack.c.bf16 %v2285_v52, %v2283_v56  ;;  %v3011_v16 = vld [vmem:[%s5320_s9] sm:$0xff] }
 0x3f3   : > { %3597 = vmatmul.mubr.msk.bf16.vlgmr.msra.gmra.mrb[4].mxu0 %vm1809_vm11, %v3869_v3 }
 0x3f4   : > { %2149 = vmatpush1.bf16.msra.mxu0 %v2138_v41  ;;  %2180 = vmatprep.mubr.bf16.mxu0 %v4063_v0  ;;  %v2354_v38 = vpop.permute.xlu0 %2353 }
 0x3f5   : > { %2224 = vmatprep.subr.bf16.mxu0 %v2215_v10  ;;  %v2358_v44 = vsel %vm1618_vm10, %v2354_v38, %v2350_v17  ;;  %v2356_v60 = vsel %vm1618_vm10, %v2350_v17, %v2354_v38 }
 0x3f6   : > { %v2362_v54 = vmul.f32 %v2358_v44, %v4726_v51  ;;  %v2361_v63 = vmul.f32 %v2356_v60, %v4743_v30 }
 0x3f8   : > { %v2367_v53 = vpack.c.bf16 %v2362_v54, %v2360_v57  ;;  %v2366_v37 = vpack.c.bf16 %v2361_v63, %v2359_v2 }
 0x3fa   : > { %v2433_v4 = vpop.permute.xlu1 %2432 }
 0x3ff   : > { %3599 = vmatmul.mubr.msk.bf16.vlgmr.msra.gmra.mrb[4].mxu0 %vm1809_vm11, %v3870_v21 }
 0x400   : > { %2225 = vmatpush1.bf16.msra.mxu0 %v2214_v31  ;;  %2256 = vmatprep.mubr.bf16.mxu0 %v4063_v0 }
 0x401   : > { %2300 = vmatprep.subr.bf16.mxu0 %v2291_v35 }
 0x40b   : > { %3601 = vmatmul.mubr.msk.bf16.vlgmr.msra.gmra.mrb[4].mxu0 %vm1809_vm11, %v3871_v55 }
 0x40c   : > { %2301 = vmatpush1.bf16.msra.mxu0 %v2290_v42  ;;  %2332 = vmatprep.mubr.bf16.mxu0 %v4063_v0 }
 0x40d   : > { %2376 = vmatprep.subr.bf16.mxu0 %v2367_v53 }
 0x417   : > { %3603 = vmatmul.mubr.msk.bf16.vlgmr.msra.gmra.mrb[4].mxu0 %vm1809_vm11, %v3872_v32 }
 0x418   : > { %2377 = vmatpush1.bf16.msra.mxu0 %v2366_v37  ;;  %2408 = vmatprep.mubr.bf16.mxu0 %v4063_v0 }
 0x423   : > { %3605 = vmatmul.mubr.msk.bf16.vlgmr.msra.gmra.mrb[4].mxu0 %vm1809_vm11, %v3873_v59 }
 0x424   : > { %2512 = vmatprep.mubr.bf16.mxu0 %v4063_v0 }
 0x4f6   : > { %v4981_v61 = vpop.f32.mrb[4].mxu0 }
 0x4f7   : > { %v4983_v3 = vpop.f32.mrb[5].mxu0 }
 0x4f8   : > { %v2414_v5 = vpop.f32.mrb[6].mxu0 }
 0x4f9   : > { %v2437_v9 = vadd.f32 %v2433_v4, %v2414_v5  ;;  %v2416_v41 = vpop.f32.mrb[7].mxu0 }
 0x4fa   : > { %v2438_v10 = vadd.f32 %v2433_v4, %v2416_v41  ;;  %v2455_v4 = vld [vmem:[%s5319_s8] sm:$0xf] }
 0x4fb   : > { %v2441_v11 = vmul.f32 0.05, %v2437_v9 }
 0x4fc   : > { %v2442_v22 = vmul.f32 0.05, %v2438_v10 }
 0x4fd   : > { %v4985_v27 = vmax.f32 %v2437_v9, %v2441_v11 }
 0x4fe   : > { %v4987_v12 = vmax.f32 %v2438_v10, %v2442_v22 }
 0x4ff   : > { %2458 = vrot.lane.b32.xlu0 %v4985_v27, %s4064_s29 }
 0x500   : > { %2460 = vrot.lane.b32.xlu1 %v4987_v12, %s4064_s29 }
 0x503   : > { %2447 = vrot.lane.b32.xlu0 %v4985_v27, %s4065_s21 }
 0x504   : > { %2449 = vrot.lane.b32.xlu1 %v4987_v12, %s4065_s21  ;;  %s556_s21 = sand.u32 1, %s5371_s17  }
 0x507   : > { %2571 = vrot.lane.b32.xlu0 %v4985_v27, %s4066_s0 }
 0x508   : > { %2573 = vrot.lane.b32.xlu1 %v4987_v12, %s4066_s0  ;;  %s3512_s0 = sshll.u32 %s556_s21, 6 }
 0x50b   : > { %2635 = vrot.lane.b32.xlu0 %v4985_v27, %s4067_s2 }
 0x50c   : > { %2637 = vrot.lane.b32.xlu1 %v4987_v12, %s4067_s2  ;;  %s5242_s2 = scalar_lea.vmem [#allocation8], %s3512_s0 }
 0x50f   : > { %2755 = vrot.lane.b32.xlu0 %v4985_v27, %s4068_s30 }
 0x510   : > { %2757 = vrot.lane.b32.xlu1 %v4987_v12, %s4068_s30  ;;  %s3409_s30 = sshll.u32 %s5242_s2, 4  ;;  %s5254_s30 = int_to_ptr.vmem [resolvable:$true] %s3409_s30 }
 0x511   : > { %s3984_s23 = scalar_lea.vmem %s5254_s30, 1024  ;;  %p3991_p4 = scmp.lt.s32.totalorder %s5254_s30, %s3989_s16 }
 0x512   : > { %p3985_p12 = scmp.ne.s32.totalorder %s5254_s30, %s3984_s23 }
 0x513   : > { %2819 = vrot.lane.b32.xlu0 %v4985_v27, %s4069_s18 }
 0x514   : > { %2821 = vrot.lane.b32.xlu1 %v4987_v12, %s4069_s18  ;;  %s3652_s18 = sshll.u32 %s4183_s25, 10  ;;  %s5269_s25 = scalar_lea.sflag [#allocation4], %s556_s21 }
 0x515   : > { %p3986_p2 = pnand %p3985_p12, %p5375_p1 }
 0x517   : > { %2883 = vrot.lane.b32.xlu0 %v4985_v27, %s4070_s26  ;;  %p3987_p3 = pneg %p3986_p2 }
 0x518   : > { %2885 = vrot.lane.b32.xlu1 %v4987_v12, %s4070_s26 }
 0x51b   : > { %2947 = vrot.lane.b32.xlu0 %v4985_v27, %s4071_s19 }
 0x51c   : > { %2949 = vrot.lane.b32.xlu1 %v4987_v12, %s4071_s19  ;;  %s5374_s19 = sld [smem:[#allocation23_spill]] }
 0x51f   : > { %1732 = vperm.xlu0 %3843, %v1727_v33  }
 0x520   : > { %595 = vperm.xlu1 %3844, %v589_v34   ;;  %v3611_v34 = vld [vmem:[%s5319_s8 + $0x8] sm:$0xf] }
 0x522   : > { %s5263_s28 = scalar_lea.hbm %s5374_s19, %s3652_s18 }
 0x523   : > { %2427 = vperm.xlu0 %3843, %v2423_v13  }
 0x524   : > { %3014 = vperm.xlu1 %3844, %v3011_v16   ;;  %v2702_v16 = vpack.c.bf16 %v4987_v12, %v4987_v12 }
 0x571   : > { %v2459_v17 = vpop.permute.xlu0 %2458 }
 0x572   : > { %v2461_v21 = vpop.permute.xlu1 %2460 }
 0x573   : > { %v2462_v25 = vsel %vm740_vm1, %v2459_v17, %v2461_v21  ;;  %v2463_v26 = vsel %vm740_vm1, %v2461_v21, %v2459_v17 }
 0x574   : > { %v2464_v29 = vmul.f32 %v2463_v26, %v4464_v45  ;;  %v2465_v31 = vmul.f32 %v2462_v25, %v4467_v46  ;;  %v3606_v46 = vld [vmem:[%s5319_s8 + $0x4] sm:$0xf] }
 0x575   : > { %v2448_v35 = vpop.permute.xlu0 %2447 }
 0x576   : > { %v2468_v38 = vpack.c.bf16 %v2464_v29, %v2464_v29  ;;  %v2469_v40 = vpack.c.bf16 %v2465_v31, %v2465_v31  ;;  %v2450_v43 = vpop.permute.xlu1 %2449 }
 0x577   : > { %v2451_v44 = vsel %vm697_vm2, %v2448_v35, %v2450_v43  ;;  %v2452_v47 = vsel %vm697_vm2, %v2450_v43, %v2448_v35  ;;  %v3614_v43 = vld [vmem:[%s5319_s8 + $0xc] sm:$0xf] }
 0x578   : > { %v2453_v50 = vmul.f32 %v2452_v47, %v4489_v7  ;;  %v2454_v52 = vmul.f32 %v2451_v44, %v4492_v8  ;;  %3607 = vmatprep.subr.msk.bf16.mxu0 %vm787_vm3, %v2469_v40  ;;  %v2475_v45 = vsel %vm787_vm3, %v2468_v38, 0  ;;  %v2701_v38 = vpack.c.bf16 %v4985_v27, %v4985_v27  ;;  %v3629_v27 = vld [vmem:[%s5319_s8 + $0x20] sm:$0xf] }
 0x579   : > { %v2572_v54 = vpop.permute.xlu0 %2571  ;;  %2481 = vmatpush1.bf16.msra.mxu0 %v2475_v45 }
 0x57a   : > { %v2456_v55 = vpack.c.bf16 %v2453_v50, %v2453_v50  ;;  %v2457_v56 = vpack.c.bf16 %v2454_v52, %v2454_v52  ;;  %v2574_v57 = vpop.permute.xlu1 %2573 }
 0x57b   : > { %v2575_v42 = vsel %vm928_vm5, %v2572_v54, %v2574_v57  ;;  %v2576_v7 = vsel %vm928_vm5, %v2574_v57, %v2572_v54 }
 0x57c   : > { %v2577_v8 = vmul.f32 %v2576_v7, %v4524_v48  ;;  %v2578_v53 = vmul.f32 %v2575_v42, %v4527_v49  ;;  %3608 = vmatmul.mubr.msk.bf16.vlgmr.msra.gmra.mrb[8].mxu0 %vm2470_vm12, %v3606_v46  ;;  %3609 = vmatprep.subr.msk.bf16.mxu0 %vm787_vm3, %v2457_v56  ;;  %v2525_v60 = vsel %vm787_vm3, %v2456_v55, 0  ;;  %v3617_v46 = vld [vmem:[%s5319_s8 + $0x10] sm:$0xf] }
 0x57d   : > { %v2636_v62 = vpop.permute.xlu0 %2635  ;;  %2531 = vmatpush1.bf16.msra.mxu0 %v2525_v60  ;;  %2562 = vmatprep.mubr.bf16.mxu0 %v4063_v0 }
 0x57e   : > { %v2582_v63 = vpack.c.bf16 %v2578_v53, %v2578_v53  ;;  %v2638_v32 = vpop.permute.xlu1 %2637  ;;  %v2581_v37 = vpack.c.bf16 %v2577_v8, %v2577_v8 }
 0x57f   : > { %v2639_v2 = vsel %vm1049_vm6, %v2636_v62, %v2638_v32  ;;  %v2640_v49 = vsel %vm1049_vm6, %v2638_v32, %v2636_v62 }
 0x580   : > { %v2642_v48 = vmul.f32 %v2639_v2, %v4558_v14  ;;  %3612 = vmatprep.subr.msk.bf16.mxu0 %vm787_vm3, %v2582_v63  ;;  %v2641_v41 = vmul.f32 %v2640_v49, %v4575_v28  ;;  %v2587_v10 = vsel %vm787_vm3, %v2581_v37, 0 }
 0x581   : > { %v2756_v59 = vpop.permute.xlu0 %2755 }
 0x582   : > { %v2646_v5 = vpack.c.bf16 %v2642_v48, %v2642_v48  ;;  %v2758_v9 = vpop.permute.xlu1 %2757  ;;  %v2645_v22 = vpack.c.bf16 %v2641_v41, %v2641_v41 }
 0x583   : > { %v2760_v17 = vsel %vm1255_vm7, %v2758_v9, %v2756_v59  ;;  %v2759_v40 = vsel %vm1255_vm7, %v2756_v59, %v2758_v9 }
 0x584   : > { %3610 = vmatmul.mubr.msk.bf16.vlgmr.msra.gmra.mrb[12].mxu0 %vm2470_vm12, %v2455_v4  ;;  %v2651_v28 = vsel %vm787_vm3, %v2645_v22, 0  ;;  %v2762_v31 = vmul.f32 %v2760_v17, %v4609_v1  ;;  %v2761_v50 = vmul.f32 %v2759_v40, %v4632_v15  ;;  %v2707_v1 = vsel %vm787_vm3, %v2701_v38, 0  ;;  %v3626_v22 = vld [vmem:[%s5319_s8 + $0x1c] sm:$0xf] }
 0x585   : > { %2593 = vmatpush1.bf16.msra.mxu0 %v2587_v10  ;;  %v2820_v14 = vpop.permute.xlu0 %2819  ;;  %2624 = vmatprep.mubr.bf16.mxu0 %v4063_v0 }
 0x586   : > { %3615 = vmatprep.subr.msk.bf16.mxu0 %vm787_vm3, %v2646_v5  ;;  %v2822_v11 = vpop.permute.xlu1 %2821  ;;  %v2766_v52 = vpack.c.bf16 %v2762_v31, %v2762_v31  ;;  %v2765_v15 = vpack.c.bf16 %v2761_v50, %v2761_v50 }
 0x587   : > { %v2823_v54 = vsel %vm1376_vm8, %v2820_v14, %v2822_v11 }
 0x588   : > { %v2825_v55 = vmul.f32 %v2823_v54, %v4669_v58  ;;  %v2771_v57 = vsel %vm787_vm3, %v2765_v15, 0 }
 0x589   : > { %v2884_v33 = vpop.permute.xlu0 %2883 }
 0x58a   : > { %v2886_v13 = vpop.permute.xlu1 %2885  ;;  %v2829_v58 = vpack.c.bf16 %v2825_v55, %v2825_v55 }
 0x58b   : > { %v2888_v42 = vsel %vm1497_vm9, %v2886_v13, %v2884_v33  ;;  %v2887_v32 = vsel %vm1497_vm9, %v2884_v33, %v2886_v13  ;;  %v4072_v33 = vmov 0.0|0.0  }
 0x58c   : > { %3613 = vmatmul.mubr.msk.bf16.vlgmr.msra.gmra.mrb[16].mxu0 %vm2470_vm12, %v3611_v34  ;;  %v2890_v60 = vmul.f32 %v2888_v42, %v4689_v6  ;;  %v2889_v39 = vmul.f32 %v2887_v32, %v4706_v24  ;;  %v2835_v4 = vsel %vm787_vm3, %v2829_v58, 0 }
 0x58d   : > { %2657 = vmatpush1.bf16.msra.mxu0 %v2651_v28  ;;  %v2948_v21 = vpop.permute.xlu0 %2947  ;;  %2688 = vmatprep.mubr.bf16.mxu0 %v4063_v0 }
 0x58e   : > { %3618 = vmatprep.subr.msk.bf16.mxu0 %vm787_vm3, %v2702_v16  ;;  %v2950_v25 = vpop.permute.xlu1 %2949  ;;  %v2894_v59 = vpack.c.bf16 %v2890_v60, %v2890_v60  ;;  %v2893_v24 = vpack.c.bf16 %v2889_v39, %v2889_v39 }
 0x58f   : > { %v2951_v26 = vsel %vm1618_vm10, %v2948_v21, %v2950_v25  ;;  %v2952_v29 = vsel %vm1618_vm10, %v2950_v25, %v2948_v21 }
 0x590   : > { %v2953_v12 = vmul.f32 %v2951_v26, %v4743_v30  ;;  %v2954_v35 = vmul.f32 %v2952_v29, %v4726_v51  ;;  %v2824_v30 = vsel %vm1376_vm8, %v2822_v11, %v2820_v14  ;;  %v3623_v14 = vld [vmem:[%s5319_s8 + $0x18] sm:$0xf]  ;;  %v2899_v11 = vsel %vm787_vm3, %v2893_v24, 0 }
 0x591   : > { %v2826_v45 = vmul.f32 %v2824_v30, %v4652_v36 }
 0x592   : > { %v2957_v44 = vpack.c.bf16 %v2953_v12, %v2953_v12  ;;  %v2958_v47 = vpack.c.bf16 %v2954_v35, %v2954_v35 }
 0x593   : > { %v2830_v56 = vpack.c.bf16 %v2826_v45, %v2826_v45 }
 0x594   : > { %3616 = vmatmul.mubr.msk.bf16.vlgmr.msra.gmra.mrb[20].mxu0 %vm2470_vm12, %v3614_v43  ;;  %3630 = vmatprep.subr.msk.bf16.mxu1 %vm787_vm3, %v2958_v47  ;;  %v2963_v51 = vsel %vm787_vm3, %v2957_v44, 0 }
 0x595   : > { %2713 = vmatpush1.bf16.msra.mxu0 %v2707_v1  ;;  %2969 = vmatpush1.bf16.msra.mxu1 %v2963_v51 }
 0x596   : > { %3621 = vmatprep.subr.msk.bf16.mxu0 %vm787_vm3, %v2766_v52  ;;  %2744 = vmatprep.mubr.bf16.mxu0 %v4063_v0 }
 0x598   : > { %3631 = vmatmul.mubr.msk.bf16.vlgmr.msra.gmra.mrb[44].mxu1 %vm2470_vm12, %v3629_v27 }
 0x59c   : > { %3619 = vmatmul.mubr.msk.bf16.vlgmr.msra.gmra.mrb[24].mxu0 %vm2470_vm12, %v3617_v46 }
 0x59d   : > { %2777 = vmatpush1.bf16.msra.mxu0 %v2771_v57  ;;  %2808 = vmatprep.mubr.bf16.mxu0 %v4063_v0 }
 0x59e   : > { %3624 = vmatprep.subr.msk.bf16.mxu0 %vm787_vm3, %v2830_v56  ;;  %v1733_v36 = vpop.permute.xlu0 %1732 }
 0x59f   : > { %v1745_v7 = vadd.f32 %v1733_v36, %v4778_v18  ;;  %v1746_v8 = vadd.f32 %v1733_v36, %v4780_v19  ;;  %v596_v53 = vpop.permute.xlu1 %595  ;;  %v3620_v18 = vld [vmem:[%s5319_s8 + $0x14] sm:$0xf] }
 0x5a0   : > { %v5129_v62 = vadd.f32 %v4338_v20, %v596_v53  ;;  %v5132_v63 = vadd.f32 %v4342_v23, %v596_v53 }
 0x5a1   : > { %v1751_v2 = vmul.f32 0.05, %v1745_v7  ;;  %v1752_v37 = vmul.f32 0.05, %v1746_v8 }
 0x5a2   : > { %v3023_v19 = vadd.f32 %v5132_v63, %v5129_v62  ;;  %v2428_v48 = vpop.permute.xlu0 %2427 }
 0x5a3   : > { %v5141_v6 = vmax.f32 %v1745_v7, %v1751_v2  ;;  %v5143_v20 = vmax.f32 %v1746_v8, %v1752_v37  ;;  %v2435_v23 = vadd.f32 %v2428_v48, %v4981_v61  ;;  %v2436_v49 = vadd.f32 %v2428_v48, %v4983_v3  ;;  %v3015_v34 = vpop.permute.xlu1 %3014 }
 0x5a4   : > { %3024 = vadd.xlane.f32.xlu0 %v3023_v19  ;;  %3622 = vmatmul.mubr.msk.bf16.vlgmr.msra.gmra.mrb[28].mxu0 %vm2470_vm12, %v3620_v18 }
 0x5a5   : > { %v2439_v5 = vmul.f32 0.05, %v2435_v23  ;;  %v2440_v9 = vmul.f32 0.05, %v2436_v49  ;;  %2841 = vmatpush1.bf16.msra.mxu0 %v2835_v4  ;;  %v3026_v41 = vadd.f32 %v5143_v20, %v5141_v6  ;;  %2872 = vmatprep.mubr.bf16.mxu0 %v4063_v0 }
 0x5a6   : > { %3627 = vmatprep.subr.msk.bf16.mxu0 %vm787_vm3, %v2894_v59 }
 0x5a7   : > { %v5154_v61 = vmax.f32 %v2435_v23, %v2439_v5  ;;  %v5156_v3 = vmax.f32 %v2436_v49, %v2440_v9  ;;  %3027 = vadd.xlane.f32.xlu1 %v3026_v41 }
 0x5a9   : > { %v3029_v10 = vadd.f32 %v5156_v3, %v5154_v61 }
 0x5ab   : > { %3030 = vadd.xlane.f32.xlu0 %v3029_v10 }
 0x5ac   : > { %3625 = vmatmul.mubr.msk.bf16.vlgmr.msra.gmra.mrb[32].mxu0 %vm2470_vm12, %v3623_v14 }
 0x5ad   : > { %2905 = vmatpush1.bf16.msra.mxu0 %v2899_v11  ;;  %2936 = vmatprep.mubr.bf16.mxu0 %v4063_v0 }
 0x5ae   : > { %3682 = vmatprep.subr.bf16.mxu0 %v4072_v33 }
 0x5b4   : > { %3628 = vmatmul.mubr.msk.bf16.vlgmr.msra.gmra.mrb[36].mxu0 %vm2470_vm12, %v3626_v22 }
 0x631   : > { %v3025_v13 = vpop.xlane.xlu0 %3024 }
 0x632   : > { %v3036_v16 = vmul.f32 0.00390625, %v3025_v13 }
 0x634   : > { %v3028_v28 = vpop.xlane.xlu1 %3027 }
 0x635   : > { %v3037_v17 = vmul.f32 0.00390625, %v3028_v28 }
 0x637   : > { %v3683_v21 = vpack.c.bf16 %v3037_v17, %v3036_v16 }
 0x639   : > { %3684 = vmatpush3.bf16.msra.mxu0 %v3683_v21 }
 0x63a   : > { %3685 = vmatprep.subr.bf16.mxu0 %v4072_v33 }
 0x64f   : > { %v2514_v25 = vpop.f32.mrb[8].mxu0 }
 0x650   : > { %v2516_v26 = vpop.f32.mrb[9].mxu0 }
 0x651   : > { %v2518_v29 = vpop.f32.mrb[10].mxu0 }
 0x652   : > { %v2519_v31 = vpop.f32.mrb[11].mxu0 }
 0x653   : > { %v4074_v31 = vmov 0.0  }
 0x654   : > { %3671 = vmatprep.mubr.msk.f32.mxu0 %vm4073_vm13, %v4074_v31 }
 0x657   : > { %v2564_v12 = vpop.f32.mrb[12].mxu0 }
 0x658   : > { %v2565_v35 = vadd.f32 %v2564_v12, %v2514_v25  ;;  %v2566_v38 = vpop.f32.mrb[13].mxu0  ;;  %v3031_v12 = vpop.xlane.xlu0 %3030 }
 0x659   : > { %v2567_v40 = vadd.f32 %v2566_v38, %v2516_v26  ;;  %v2568_v43 = vpop.f32.mrb[14].mxu0  ;;  %v3038_v38 = vmul.f32 0.00390625, %v3031_v12 }
 0x65a   : > { %v2569_v44 = vpop.f32.mrb[15].mxu0 }
 0x65b   : > { %v3116_v44 = vld [vmem:[%s5323_s12] sm:$0xff] }
 0x65c   : > { %3676 = vmatprep.mubr.msk.f32.mxu1 %vm3124_vm14, %v3116_v44 }
 0x65f   : > { %v2626_v47 = vpop.f32.mrb[16].mxu0 }
 0x660   : > { %v2633_v50 = vadd.f32 %v2626_v47, %v2565_v35  ;;  %v2628_v52 = vpop.f32.mrb[17].mxu0  ;;  %v3041_v47 = vld [vmem:[%s5322_s11] sm:$0x3] }
 0x661   : > { %v2634_v1 = vadd.f32 %v2628_v52, %v2567_v40  ;;  %v2630_v51 = vpop.f32.mrb[18].mxu0 }
 0x662   : > { %v2631_v30 = vpop.f32.mrb[19].mxu0 }
 0x663   : > { %v3117_v30 = vld [vmem:[%s5323_s12 + $0x8] sm:$0xff] }
 0x667   : > { %v2690_v27 = vpop.f32.mrb[20].mxu0 }
 0x668   : > { %v2697_v15 = vadd.f32 %v2690_v27, %v2633_v50  ;;  %v2692_v45 = vpop.f32.mrb[21].mxu0  ;;  %v3118_v27 = vld [vmem:[%s5323_s12 + $0x10] sm:$0xff] }
 0x669   : > { %v2698_v54 = vadd.f32 %v2692_v45, %v2634_v1  ;;  %v2694_v46 = vpop.f32.mrb[22].mxu0  ;;  %v3121_v45 = vld [vmem:[%s5324_s13 + $0x8] sm:$0xff] }
 0x66a   : > { %v2695_v55 = vpop.f32.mrb[23].mxu0 }
 0x66b   : > { %v3002_v56 = vpop.f32.mrb[44].mxu1 }
 0x66c   : > { %v3004_v57 = vpop.f32.mrb[45].mxu1 }
 0x66d   : > { %v3006_v42 = vpop.f32.mrb[46].mxu1 }
 0x66e   : > { %v3007_v36 = vpop.f32.mrb[47].mxu1  ;;  %v3123_v42 = vld [vmem:[%s5324_s13 + $0x18] sm:$0xff] }
 0x66f   : > { %v2746_v7 = vpop.f32.mrb[24].mxu0 }
 0x670   : > { %v2753_v8 = vadd.f32 %v2746_v7, %v2697_v15  ;;  %v2748_v53 = vpop.f32.mrb[25].mxu0  ;;  %v3119_v15 = vld [vmem:[%s5323_s12 + $0x18] sm:$0xff]  ;;  %v3122_v7 = vld [vmem:[%s5324_s13 + $0x10] sm:$0xff] }
 0x671   : > { %v2754_v58 = vadd.f32 %v2748_v53, %v2698_v54  ;;  %v2750_v60 = vpop.f32.mrb[26].mxu0  ;;  %v3120_v54 = vld [vmem:[%s5324_s13] sm:$0xff] }
 0x672   : > { %v2751_v32 = vpop.f32.mrb[27].mxu0 }
 0x677   : > { %v2810_v2 = vpop.f32.mrb[28].mxu0 }
 0x678   : > { %v2817_v37 = vadd.f32 %v2810_v2, %v2753_v8  ;;  %v2812_v18 = vpop.f32.mrb[29].mxu0 }
 0x679   : > { %v2818_v19 = vadd.f32 %v2812_v18, %v2754_v58  ;;  %v2814_v48 = vpop.f32.mrb[30].mxu0 }
 0x67a   : > { %v2815_v23 = vpop.f32.mrb[31].mxu0 }
 0x67f   : > { %v2874_v49 = vpop.f32.mrb[32].mxu0 }
 0x680   : > { %v2881_v39 = vadd.f32 %v2874_v49, %v2817_v37  ;;  %v2876_v59 = vpop.f32.mrb[33].mxu0 }
 0x681   : > { %v2882_v4 = vadd.f32 %v2876_v59, %v2818_v19  ;;  %v2878_v5 = vpop.f32.mrb[34].mxu0 }
 0x682   : > { %v2879_v9 = vpop.f32.mrb[35].mxu0 }
 0x687   : > { %v2938_v41 = vpop.f32.mrb[36].mxu0 }
 0x688   : > { %v2945_v24 = vadd.f32 %v2938_v41, %v2881_v39  ;;  %v2940_v10 = vpop.f32.mrb[37].mxu0  ;;  %v3286_v41 = vld [vmem:[%s5326_s15] sm:$0xff] }
 0x689   : > { %v2946_v14 = vadd.f32 %v2940_v10, %v2882_v4  ;;  %v2942_v11 = vpop.f32.mrb[38].mxu0  ;;  %v3288_v10 = vld [vmem:[%s5326_s15 + $0x10] sm:$0xff] }
 0x68a   : > { %v3009_v22 = vadd.f32 %v3002_v56, %v2945_v24  ;;  %v2943_v33 = vpop.f32.mrb[39].mxu0  ;;  %v3287_v11 = vld [vmem:[%s5326_s15 + $0x8] sm:$0xff] }
 0x68b   : > { %v3010_v13 = vadd.f32 %v3004_v57, %v2946_v14 }
 0x68c   : > { %v3017_v28 = vadd.f32 %v3015_v34, %v3009_v22  ;;  %v3289_v22 = vld [vmem:[%s5326_s15 + $0x18] sm:$0xff] }
 0x68d   : > { %v3018_v16 = vadd.f32 %v3015_v34, %v3010_v13  ;;  %v3040_v34 = vld [vmem:[%s5321_s10] sm:$0x3] }
 0x68e   : > { %v3019_v17 = vmul.f32 0.05, %v3017_v28 }
 0x68f   : > { %v3020_v21 = vmul.f32 0.05, %v3018_v16 }
 0x690   : > { %v5170_v25 = vmax.f32 %v3017_v28, %v3019_v17 }
 0x691   : > { %v5172_v26 = vmax.f32 %v3018_v16, %v3020_v21 }
 0x693   : > { %v3032_v29 = vadd.f32 %v5172_v26, %v5170_v25 }
 0x695   : > { %3033 = vadd.xlane.f32.xlu0 %v3032_v29 }
 0x722   : > { %v3034_v35 = vpop.xlane.xlu0 %3033 }
 0x723   : > { %v3039_v40 = vmul.f32 0.00390625, %v3034_v35 }
 0x725   : > { %v3686_v43 = vpack.c.bf16 %v3039_v40, %v3038_v38 }
 0x727   : > { %3687 = vmatpush3.bf16.msra.mxu0 %v3686_v43 }
 0x72a   : > { %3672 = vmatmul.mubr.msk.f32.vlgmr.msra.gmra.mrb[40].mxu0 %vm623_vm0, %v3040_v34 }
 0x72b   : > { %3358 = vmatprep.mubr.bf16.mxu0 %v4063_v0 }
 0x7fd   : > { %v3111_v50 = vpop.f32.mrb[40].mxu0 }
 0x7fe   : > { %v3112_v52 = vadd.f32 %v3111_v50, %v3041_v47  ;;  %v3673_v1 = vpop.f32.mrb[41].mxu0 }
 0x800   : > { %v3115_v51 = vmax.f32 %v3112_v52, 0.0 }
 0x802   : > { %3674 = vmatprep.subr.msk.mxu1 %vm3137_vm15, %v3115_v51 }
 0x803   : > { %3675 = vmatpush3.msk.msra.mxu1 %vm3137_vm15, %v3115_v51 }
 0x804   : > { %3677 = vmatmul.mubr.msk.f32.vlgmr.msra.gmra.mrb[48].mxu1 %vm3124_vm14, %v3117_v30  ;;  %v3893_v30 = vld [vmem:[%s4315_s22 + $0x8] sm:$0xff] }
 0x805   : > { %3679 = vmatprep.mubr.msk.f32.mxu1 %vm3124_vm14, %v3118_v27 }
 0x808   : > { %3680 = vmatmul.mubr.msk.f32.gmra.mrb[50].mxu1 %vm3124_vm14, %v3119_v15 }
 0x8d7   : > { %v3678_v46 = vpop.f32.mrb[48].mxu1 }
 0x8d8   : > { %v3213_v55 = vadd.f32 %v3678_v46, %v3121_v45  ;;  %v3207_v56 = vpop.f32.mrb[49].mxu1  ;;  %v3894_v45 = vld [vmem:[%s4315_s22 + $0x10] sm:$0xff]  ;;  %v3895_v46 = vld [vmem:[%s4315_s22 + $0x18] sm:$0xff] }
 0x8d9   : > { %v3208_v57 = vadd.f32 %v3207_v56, %v3120_v54 }
 0x8da   : > { %v3639_v36 = vmul.f32 -1.442695, %v3213_v55 }
 0x8db   : > { %v3638_v8 = vmul.f32 -1.442695, %v3208_v57  ;;  %v3681_v53 = vpop.f32.mrb[50].mxu1 }
 0x8dc   : > { %3876 = vpow2.f32 %v3639_v36  ;;  %v3223_v58 = vadd.f32 %v3681_v53, %v3123_v42  ;;  %v3217_v60 = vpop.f32.mrb[51].mxu1 }
 0x8dd   : > { %3878 = vpow2.f32 %v3638_v8  ;;  %v3218_v32 = vadd.f32 %v3217_v60, %v3122_v7 }
 0x8de   : > { %v3641_v2 = vmul.f32 -1.442695, %v3223_v58  ;;  %v3896_v58 = vld [vmem:[%s4315_s22 + $0x20] sm:$0xff] }
 0x8df   : > { %v3640_v37 = vmul.f32 -1.442695, %v3218_v32 }
 0x8e0   : > { %3880 = vpow2.f32 %v3641_v2 }
 0x8e1   : > { %3882 = vpow2.f32 %v3640_v37  ;;  %v3897_v37 = vld [vmem:[%s4315_s22 + $0x28] sm:$0xff] }
 0x8e6   : > { %v3877_v18 = vpop.eup %3876 }
 0x8e7   : > { %v3879_v19 = vpop.eup %3878  ;;  %v3239_v48 = vadd.f32 1.0, %v3877_v18 }
 0x8e8   : > { %v3238_v23 = vadd.f32 1.0, %v3879_v19 }
 0x8e9   : > { %3884 = vrcp.f32 %v3239_v48  ;;  %v3898_v48 = vld [vmem:[%s4315_s22 + $0x30] sm:$0xff] }
 0x8ea   : > { %v3881_v49 = vpop.eup %3880  ;;  %3886 = vrcp.f32 %v3238_v23 }
 0x8eb   : > { %v3883_v39 = vpop.eup %3882  ;;  %v3241_v4 = vadd.f32 1.0, %v3881_v49  ;;  %v3899_v49 = vld [vmem:[%s4315_s22 + $0x38] sm:$0xff] }
 0x8ec   : > { %v3240_v59 = vadd.f32 1.0, %v3883_v39 }
 0x8ee   : > { %3888 = vrcp.f32 %v3240_v59 }
 0x8ef   : > { %3890 = vrcp.f32 %v3241_v4 }
 0x8f3   : > { %v3885_v5 = vpop.eup %3884 }
 0x8f4   : > { %v3887_v9 = vpop.eup %3886  ;;  %3257 = vperm.xlu0 %3843, %v3885_v5  }
 0x8f5   : > { %3252 = vperm.xlu1 %3844, %v3887_v9  }
 0x8f8   : > { %v3889_v24 = vpop.eup %3888  ;;  %3292 = vperm.xlu0 %3843, %v3286_v41  }
 0x8f9   : > { %3262 = vperm.xlu1 %3844, %v3889_v24   ;;  %v3891_v14 = vpop.eup %3890 }
 0x8fc   : > { %3302 = vperm.xlu0 %3843, %v3288_v10  }
 0x8fd   : > { %3267 = vperm.xlu1 %3844, %v3891_v14  }
 0x901   : > { %3297 = vperm.xlu1 %3844, %v3287_v11  }
 0x905   : > { %3307 = vperm.xlu1 %3844, %v3289_v22  }
 0x973   : > { %v3258_v33 = vpop.permute.xlu0 %3257 }
 0x974   : > { %v3272_v13 = vmul.f32 %v3258_v33, %v5141_v6  ;;  %v3273_v28 = vmul.f32 %v3258_v33, %v5143_v20  ;;  %v3253_v16 = vpop.permute.xlu1 %3252 }
 0x975   : > { %v3270_v17 = vmul.f32 %v3253_v16, %v5129_v62  ;;  %v3271_v21 = vmul.f32 %v3253_v16, %v5132_v63  ;;  %v3874_v63 = vld [vmem:[%s5372_s20] sm:$0xff]  }
 0x977   : > { %v3282_v29 = vpack.c.bf16 %v3272_v13, %v3270_v17  ;;  %v3283_v31 = vpack.c.bf16 %v3273_v28, %v3271_v21 }
 0x978   : > { %v3263_v12 = vpop.permute.xlu1 %3262 }
 0x979   : > { %3326 = vmatprep.subr.bf16.mxu0 %v3283_v31  ;;  %v3274_v38 = vmul.f32 %v3263_v12, %v5154_v61  ;;  %v3275_v40 = vmul.f32 %v3263_v12, %v5156_v3  ;;  %v3875_v61 = vld [vmem:[%s5372_s20 + $0x8] sm:$0xff]   ;;  %v3293_v3 = vpop.permute.xlu0 %3292 }
 0x97a   : > { %3327 = vmatpush1.bf16.msra.mxu0 %v3282_v29 }
 0x97c   : > { %v3268_v35 = vpop.permute.xlu1 %3267 }
 0x97d   : > { %v3276_v6 = vmul.f32 %v3268_v35, %v5170_v25  ;;  %v3277_v20 = vmul.f32 %v3268_v35, %v5172_v26  ;;  %v3303_v56 = vpop.permute.xlu0 %3302 }
 0x97f   : > { %v3284_v43 = vpack.c.bf16 %v3276_v6, %v3274_v38  ;;  %v3285_v62 = vpack.c.bf16 %v3277_v20, %v3275_v40 }
 0x980   : > { %v3298_v44 = vpop.permute.xlu1 %3297 }
 0x981   : > { %3328 = vmatprep.subr.bf16.mxu0 %v3285_v62 }
 0x982   : > { %3329 = vmatpush1.bf16.msra.mxu0 %v3284_v43 }
 0x984   : > { %v3308_v7 = vpop.permute.xlu1 %3307 }
 0x985   : > { %3644 = vmatmul.mubr.msk.bf16.vlgmr.msra.gmra.mrb[44].mxu0 %vm623_vm0, %v3874_v63 }
 0x986   : > { %3368 = vmatprep.mubr.bf16.mxu0 %v4063_v0  ;;  %v3892_v0 = vld [vmem:[%s4315_s22] sm:$0xff]  ;;  %s3990_s22 = scalar_lea.vmem %s3989_s16, 2048 }
 0x987   : > { %p3992_p7 = scmp.lt.s32.totalorder %s3990_s22, %s3984_s23 }
 0x989   : > { %p3993_p8 = por %p3992_p7, %p3991_p4 }
 0x98b   : > { %p3994_p11 = pnand %p3993_p8, %p3987_p3 }
 0x98d   : > { %3645 = vmatmul.mubr.msk.bf16.gmra.mrb[48].mxu0 %vm623_vm0, %v3875_v61 }
 0xa58   : > { %v3360_v25 = vpop.f32.mrb[44].mxu0 }
 0xa59   : > { %v3361_v26 = vadd.f32 %v3360_v25, %v3293_v3  ;;  %v3362_v34 = vpop.f32.mrb[45].mxu0 }
 0xa5a   : > { %v3363_v47 = vadd.f32 %v3362_v34, %v3293_v3  ;;  %v3364_v50 = vpop.f32.mrb[46].mxu0 }
 0xa5b   : > { %v3379_v52 = vadd.f32 %v3892_v0, %v3361_v26  ;;  %v3365_v1 = vadd.f32 %v3364_v50, %v3298_v44  ;;  %v3366_v51 = vpop.f32.mrb[47].mxu0 }
 0xa5c   : > { %v3380_v27 = vadd.f32 %v3893_v30, %v3363_v47  ;;  %v3367_v15 = vadd.f32 %v3366_v51, %v3298_v44 }
 0xa5d   : > { %3387 = vst [vmem:[%s5242_s2] sm:$0xff] %v3379_v52  ;;  %v3381_v54 = vadd.f32 %v3894_v45, %v3365_v1 }
 0xa5e   : > { %3388 = vst [vmem:[%s5242_s2 + $0x8] sm:$0xff] %v3380_v27  ;;  %v3382_v55 = vadd.f32 %v3895_v46, %v3367_v15 }
 0xa5f   : > { %3389 = vst [vmem:[%s5242_s2 + $0x10] sm:$0xff] %v3381_v54 }
 0xa60   : > { %3390 = vst [vmem:[%s5242_s2 + $0x18] sm:$0xff] %v3382_v55  ;;  %v3370_v57 = vpop.f32.mrb[48].mxu0 }
 0xa61   : > { %v3371_v42 = vadd.f32 %v3370_v57, %v3303_v56  ;;  %v3372_v36 = vpop.f32.mrb[49].mxu0 }
 0xa62   : > { %v3373_v8 = vadd.f32 %v3372_v36, %v3303_v56  ;;  %v3374_v53 = vpop.f32.mrb[50].mxu0 }
 0xa63   : > { %v3383_v60 = vadd.f32 %v3896_v58, %v3371_v42  ;;  %v3375_v32 = vadd.f32 %v3374_v53, %v3308_v7  ;;  %v3376_v2 = vpop.f32.mrb[51].mxu0 }
 0xa64   : > { %v3384_v18 = vadd.f32 %v3897_v37, %v3373_v8  ;;  %v3377_v19 = vadd.f32 %v3376_v2, %v3308_v7 }
 0xa65   : > { %3391 = vst [vmem:[%s5242_s2 + $0x20] sm:$0xff] %v3383_v60  ;;  %v3385_v23 = vadd.f32 %v3898_v48, %v3375_v32 }
 0xa66   : > { %3392 = vst [vmem:[%s5242_s2 + $0x28] sm:$0xff] %v3384_v18  ;;  %v3386_v39 = vadd.f32 %v3899_v49, %v3377_v19 }
 0xa67   : > { %3393 = vst [vmem:[%s5242_s2 + $0x30] sm:$0xff] %v3385_v23 }
 0xa68   : > { %3394 = vst [vmem:[%s5242_s2 + $0x38] sm:$0xff] %v3386_v39 }
 0xa69   : > { %3997 = shalt.err (!%p3994_p11)
}
 0xa6a   : > { %s3998_s17 = scalar_lea.hbm %s5263_s28, 1024  ;;  %s4002_s2 = scalar_lea.hbm %s5374_s19, 2048 }
 0xa6b   : > { %p3999_p5 = scmp.ne.s32.totalorder %s5263_s28, %s3998_s17  ;;  %p4003_p9 = scmp.lt.u32.totalorder %s5263_s28, %s5374_s19 }
 0xa6c   : > { %p4004_p10 = scmp.lt.u32.totalorder %s4002_s2, %s3998_s17  ;;  %p4006_p12 = scmp.lt.u32.totalorder %s3998_s17, %s5263_s28 }
 0xa6d   : > { %p4000_p0 = pnand %p3999_p5, %p5375_p1 }
 0xa6e   : > { %p4005_p13 = por %p4004_p10, %p4003_p9 }
 0xa6f   : > { %p4001_p6 = pneg %p4000_p0 }
 0xa70   : > { %p4007_p2 = por %p4006_p12, %p4005_p13 }
 0xa72   : > { %p4008_p3 = pnand %p4007_p2, %p4001_p6 }
 0xa74   : > { %4011 = shalt.err (!%p4008_p3)
}
 0xa75   : > { %s4076_s27 = smov 256  }
 0xa76   : > { %3768 = dma.vmem_to_hbm [thread:$0]  (%p5375_p1), %s5254_s30, 1024, %s5263_s28, %s5269_s25, %s4076_s27, %s4076_s27, %s4064_s29  }
 0xa77 PF: > { %s5376_s23 = sld [smem:[#allocation15_spill]]  ;;  %s5377_s14 = sld [smem:[#allocation12_spill]] }
 0xa78   : > { %s5378_s16 = sld [smem:[#allocation19_spill]] }
 0xa7d   : > { %p3790_p4 = scmp.ge.s32.totalorder %s5376_s23, 2  ;;  %s3424_s22 = sand.u32 1, %s5377_s14  }
 0xa7e   : > { %p5379_p7 = scmp.ne.s32.totalorder %s5378_s16, 0  ;;  %s3425_s17 = scalar_lea.sflag [#allocation4], %s3424_s22 }
 0xa80   : > { %p3781_p8 = pnand %p3790_p4, %p5379_p7 }
 0xa82   : > { %4037 = dma.done.wait (!%p3781_p8), %s3425_s17, 1024  }
 0xa83   : > { %4039 = vsyncadd (!%p3781_p8), %s3425_s17, 4294966272  ;;  %s5380_s24 = sld [smem:[#allocation16_spill]]  ;;  %s5381_s21 = sld [smem:[#allocation13_spill]] }
 0xa84   : > { %s5382_s22 = sld [smem:[#allocation14_spill]]  ;;  %s5383_s23 = sld [smem:[#allocation17_spill]] }
 0xa89   : > { %p28_p11 = scmp.ge.s32.totalorder %s5380_s24, 4  }
 0xa8b   :  { %30 = sbr.rel (!%p28_p11) target bundleno = 10 (0xa), region = 156 }
 0xa92   :  { %3430 = vsyncpa [#allocation3], 1 }
 0xa93   :  { %3432 = vsyncpa [#allocation3 + $0x1], 1 }
 0xa94   :  { %3433 = vsyncpa [#allocation6], 1 }
 0xa95   :  { %3434 = vsyncpa [#allocation4], 1 }
 0xa96   :  { %3436 = vsyncpa [#allocation4 + $0x1], 1 }

</bundles_post_ra>
